<compile_context>
chip_gen: v7x
topology: tpu7x:2x2x1
jax: 0.10.0
libtpu: 0.0.40
codegen_flags: <defaults>
</compile_context>

<pallas_src>
import jax
import jax.numpy as jnp
from jax.experimental import pallas as pl
from jax.experimental.pallas import tpu as pltpu


_HEADS = 4
_HIDDEN = 256
_NEG_INF = -1e30


# ----------------------------------------------------------------------------
# Fused Pallas kernel, one grid step per GAT layer.
#   step 0: h1 = relu(gat1(x))
#   step 1: h2 = relu(gat2(h1)) + h1
#   step 2: h3 = relu(gat3(h2)) + h2 ; pool -> MLP -> LayerNorm -> out
# ----------------------------------------------------------------------------
def fused_gat_encoder_kernel(
    x_ref, ab_ref, w_ref, b_ref,
    pw1_ref, pb1_ref, pw2_ref, pb2_ref, gamma_ref, beta_ref,
    out_ref, h_ref,
):
    layer = pl.program_id(0)
    n_layers = pl.num_programs(0)
    N = x_ref.shape[0]
    H = _HEADS
    C = b_ref.shape[1]
    HC = H * C

    # First grid step: seed the carried activation with the (padded) node feats.
    @pl.when(layer == 0)
    def _():
        h_ref[...] = x_ref[...]

    # Precomputed additive bias: log(edge multiplicity) for edges, -1e30 else.
    att_bias = ab_ref[...].astype(jnp.float32)
    h = h_ref[...]

    # One MXU pass: per-head features AND per-head attention logits.
    hw_full = jnp.dot(h.astype(jnp.bfloat16), w_ref[...],
                      preferred_element_type=jnp.float32)       # [N, WAUG]
    alpha_dst = hw_full[:, HC:HC + H]                            # [N, H]
    alpha_src_t = jnp.transpose(hw_full[:, HC + H:HC + 2 * H])   # [H, N] (tiny)
    hw = hw_full[:, :HC].astype(jnp.bfloat16)                    # [N, H*C] bf16

    acc = jnp.zeros((N, C), jnp.float32)
    for hd in range(H):  # H is static -> unrolled
        # scores[i, j] = a_dst·Wh_i + a_src·Wh_j   (message j -> i)
        s = alpha_dst[:, hd:hd + 1] + alpha_src_t[hd:hd + 1, :]  # [N, N]
        s = jnp.maximum(s, 0.2 * s)                              # LeakyReLU(0.2)
        s = s + att_bias                                         # mask + multiplicity
        s = s - jnp.max(s, axis=-1, keepdims=True)
        p = jnp.exp(s)
        inv = pl.reciprocal(jnp.sum(p, axis=-1, keepdims=True), approx=True)
        agg = jnp.dot(p.astype(jnp.bfloat16), hw[:, hd * C:(hd + 1) * C],
                      preferred_element_type=jnp.float32)        # [N, C]
        acc = acc + inv * agg

    layer_out = jnp.maximum(acc * (1.0 / H) + b_ref[...], 0.0)   # head mean + bias, ReLU
    new_h = layer_out + jnp.where(layer > 0, h, jnp.zeros_like(h))   # residual (layers 2,3)
    h_ref[...] = new_h

    # Final step: global_mean_pool -> Linear -> ReLU -> Linear -> LayerNorm
    @pl.when(layer == n_layers - 1)
    def _():
        g = jnp.mean(new_h, axis=0, keepdims=True)               # [1, 256]
        z = jnp.dot(g, pw1_ref[...], preferred_element_type=jnp.float32) + pb1_ref[...]
        z = jnp.maximum(z, 0.0)
        # TODO(synk): dropout between the projection linears omitted (eval mode).
        z = jnp.dot(z, pw2_ref[...], preferred_element_type=jnp.float32) + pb2_ref[...]
        mu = jnp.mean(z, axis=-1, keepdims=True)
        var = jnp.mean((z - mu) ** 2, axis=-1, keepdims=True)
        zn = (z - mu) * jax.lax.rsqrt(var + 1e-5)
        out_ref[...] = zn * gamma_ref[...] + beta_ref[...]


# ----------------------------------------------------------------------------
# Wrapper
# ----------------------------------------------------------------------------
def _augment_weight(w, a_src, a_dst, f_pad, w_aug_cols):
    """[W | W@a_dst | W@a_src], zero-padded to [f_pad, w_aug_cols], bf16.

    Folding the attention projections into the feature matmul lets a single
    MXU pass produce hw, alpha_dst and alpha_src.
    """
    f_in, _ = w.shape
    H, C = a_src.shape
    w3 = w.reshape(f_in, H, C)
    w_adst = jnp.einsum("fhc,hc->fh", w3, a_dst)    # [F_in, H]
    w_asrc = jnp.einsum("fhc,hc->fh", w3, a_src)    # [F_in, H]
    aug = jnp.concatenate([w, w_adst, w_asrc], axis=1)
    aug = jnp.pad(aug, ((0, f_pad - f_in), (0, w_aug_cols - aug.shape[1])))
    return aug.astype(jnp.bfloat16)


@jax.jit
def gat_graph_encoder_forward(x, edge_index, params):
    """Forward pass of GATGraphEncoder (batch=None -> single graph)."""
    N, F = x.shape
    H = _HEADS
    C = _HIDDEN
    HC = H * C
    # TODO(synk): node_feature_dim > hidden would need a wider carried scratch.
    assert F <= C, "node_feature_dim > hidden not supported by this fused kernel"
    WAUG = ((HC + 2 * H + 127) // 128) * 128        # lane-pad augmented weights

    # Dense edge-count matrix cnt[dst, src] (f32 math); GATConv(add_self_loops
    # =True) removes existing self loops and adds exactly one per node.  The
    # additive bias log(cnt) (-1e30 for non-edges) both masks non-edges and
    # reproduces PyG's edge-wise softmax for duplicate (src,dst) pairs; it is
    # shipped to the kernel once as bf16 (half the [N,N] HBM/VMEM bytes).
    cnt = jnp.zeros((N, N), jnp.float32).at[edge_index[1], edge_index[0]].add(1.0)
    eye = jnp.eye(N, dtype=jnp.float32)
    cnt = cnt * (1.0 - eye) + eye
    att_bias = jnp.where(cnt > 0.0, jnp.log(jnp.maximum(cnt, 1.0)), _NEG_INF)
    att_bias = att_bias.astype(jnp.bfloat16)

    # Pad node features to the hidden width so all three layers share one
    # stacked weight tensor (enables the grid=(3,) weight-prefetch pipeline).
    x_pad = jnp.pad(x.astype(jnp.float32), ((0, 0), (0, C - F)))

    w_stack, b_stack = [], []
    for li in (1, 2, 3):
        w, a_src, a_dst, bias = params[f"conv{li}"]
        w_stack.append(_augment_weight(w, a_src, a_dst, C, WAUG))
        b_stack.append(bias.reshape(1, 1, C))
    w_all = jnp.stack(w_stack, axis=0)              # [3, C, WAUG] bf16
    b_all = jnp.concatenate(b_stack, axis=0)        # [3, 1, C]    f32

    pw1, pb1, pw2, pb2, gamma, beta = params["proj"]
    E = pw2.shape[1]

    grid_spec = pltpu.PrefetchScalarGridSpec(
        num_scalar_prefetch=0,
        grid=(3,),
        in_specs=[
            pl.BlockSpec((N, C), lambda l: (0, 0)),              # x_pad (resident)
            pl.BlockSpec((N, N), lambda l: (0, 0)),              # att_bias (resident)
            pl.BlockSpec((None, C, WAUG), lambda l: (l, 0, 0)),  # per-layer aug weight
            pl.BlockSpec((None, 1, C), lambda l: (l, 0, 0)),     # per-layer bias
            pl.BlockSpec((C, C), lambda l: (0, 0)),              # proj W1
            pl.BlockSpec((1, C), lambda l: (0, 0)),              # proj b1
            pl.BlockSpec((C, E), lambda l: (0, 0)),              # proj W2
            pl.BlockSpec((1, E), lambda l: (0, 0)),              # proj b2
            pl.BlockSpec((1, E), lambda l: (0, 0)),              # LN gamma
            pl.BlockSpec((1, E), lambda l: (0, 0)),              # LN beta
        ],
        out_specs=pl.BlockSpec((1, E), lambda l: (0, 0)),
        scratch_shapes=[pltpu.VMEM((N, C), jnp.float32)],        # carried activation h
    )

    return pl.pallas_call(
        fused_gat_encoder_kernel,
        out_shape=jax.ShapeDtypeStruct((1, E), jnp.float32),
        grid_spec=grid_spec,
        compiler_params=pltpu.CompilerParams(
            dimension_semantics=("arbitrary",),                  # layer carry dependency
            vmem_limit_bytes=64 * 1024 * 1024,
        ),
    )(x_pad, att_bias, w_all, b_all, pw1, pb1, pw2, pb2, gamma, beta)


# ----------------------------------------------------------------------------
# Deterministic parameter initialization
# ----------------------------------------------------------------------------
def init_params(key, node_feature_dim, embedding_dim, heads=_HEADS, hidden=_HIDDEN):
    def glorot(k, shape):
        fan_in = shape[0]
        return jax.random.normal(k, shape, jnp.float32) / jnp.sqrt(jnp.float32(fan_in))

    keys = jax.random.split(key, 16)
    params = {}
    fan_ins = [node_feature_dim, hidden, hidden]
    ki = 0
    for li, f_in in enumerate(fan_ins, start=1):
        w = glorot(keys[ki], (f_in, heads * hidden)); ki += 1
        a_src = 0.1 * jax.random.normal(keys[ki], (heads, hidden), jnp.float32); ki += 1
        a_dst = 0.1 * jax.random.normal(keys[ki], (heads, hidden), jnp.float32); ki += 1
        bias = jnp.zeros((1, hidden), jnp.float32)
        params[f"conv{li}"] = (w, a_src, a_dst, bias)

    w1 = glorot(keys[ki], (hidden, hidden)); ki += 1
    b1 = jnp.zeros((1, hidden), jnp.float32)
    w2 = glorot(keys[ki], (hidden, embedding_dim)); ki += 1
    b2 = jnp.zeros((1, embedding_dim), jnp.float32)
    gamma = jnp.ones((1, embedding_dim), jnp.float32)   # nn.LayerNorm default init
    beta = jnp.zeros((1, embedding_dim), jnp.float32)
    params["proj"] = (w1, b1, w2, b2, gamma, beta)
    return params


# ----------------------------------------------------------------------------
# Main
# ----------------------------------------------------------------------------
if __name__ == "__main__":
    NODE_FEATURE_DIM = 32
    EMBEDDING_DIM = 32
    NUM_NODES = 16
    NUM_EDGES = 40

    root = jax.random.PRNGKey(0)
    k_x, k_src, k_dst, k_params = jax.random.split(root, 4)

    x = jax.random.normal(k_x, (NUM_NODES, NODE_FEATURE_DIM), jnp.float32)
    src = jax.random.randint(k_src, (NUM_EDGES,), 0, NUM_NODES)
    dst = jax.random.randint(k_dst, (NUM_EDGES,), 0, NUM_NODES)
    edge_index = jnp.stack([src, dst], axis=0)          # [2, E] COO (source, target)

    params = init_params(k_params, NODE_FEATURE_DIM, EMBEDDING_DIM)

    out = gat_graph_encoder_forward(x, edge_index, params)
    out = jax.block_until_ready(out)

    assert out.shape == (1, EMBEDDING_DIM), out.shape
    assert bool(jnp.all(jnp.isfinite(out)))
    print("KERNEL_OK")
</pallas_src>

<mosaic_0001>
module attributes {stable_mosaic.version = 11 : i64} {
  func.func @fused_gat_encoder_kernel(%arg0: i32, %arg1: memref<16x256xf32, #tpu.memory_space<vmem>>, %arg2: memref<16x16xbf16, #tpu.memory_space<vmem>>, %arg3: memref<1x256x1152xbf16, #tpu.memory_space<vmem>>, %arg4: memref<1x1x256xf32, #tpu.memory_space<vmem>>, %arg5: memref<256x256xf32, #tpu.memory_space<vmem>>, %arg6: memref<1x256xf32, #tpu.memory_space<vmem>>, %arg7: memref<256x32xf32, #tpu.memory_space<vmem>>, %arg8: memref<1x32xf32, #tpu.memory_space<vmem>>, %arg9: memref<1x32xf32, #tpu.memory_space<vmem>>, %arg10: memref<1x32xf32, #tpu.memory_space<vmem>>, %arg11: memref<1x32xf32, #tpu.memory_space<vmem>>, %arg12: memref<16x256xf32, #tpu.memory_space<vmem>>) attributes {dimension_semantics = [#tpu.dimension_semantics<arbitrary>], iteration_bounds = array<i64: 3>, scalar_prefetch = 0 : i64, scratch_operands = 1 : i64, tpu.core_type = #tpu.core_type<tc>, window_params = [{pipeline_mode = #tpu.pipeline_mode<synchronous>, transform_indices = @transform_0, window_bounds = array<i64: 16, 256>}, {pipeline_mode = #tpu.pipeline_mode<synchronous>, transform_indices = @transform_1, window_bounds = array<i64: 16, 16>}, {transform_indices = @transform_2, window_bounds = array<i64: 1, 256, 1152>}, {transform_indices = @transform_3, window_bounds = array<i64: 1, 1, 256>}, {pipeline_mode = #tpu.pipeline_mode<synchronous>, transform_indices = @transform_4, window_bounds = array<i64: 256, 256>}, {pipeline_mode = #tpu.pipeline_mode<synchronous>, transform_indices = @transform_5, window_bounds = array<i64: 1, 256>}, {pipeline_mode = #tpu.pipeline_mode<synchronous>, transform_indices = @transform_6, window_bounds = array<i64: 256, 32>}, {pipeline_mode = #tpu.pipeline_mode<synchronous>, transform_indices = @transform_7, window_bounds = array<i64: 1, 32>}, {pipeline_mode = #tpu.pipeline_mode<synchronous>, transform_indices = @transform_8, window_bounds = array<i64: 1, 32>}, {pipeline_mode = #tpu.pipeline_mode<synchronous>, transform_indices = @transform_9, window_bounds = array<i64: 1, 32>}, {pipeline_mode = #tpu.pipeline_mode<synchronous>, transform_indices = @transform_10, window_bounds = array<i64: 1, 32>}]} {
    %c0_i32 = arith.constant 0 : i32
    %0 = arith.cmpi eq, %arg0, %c0_i32 : i32
    %1 = arith.extui %0 : i1 to i32
    %c0_i32_0 = arith.constant 0 : i32
    %2 = arith.cmpi ne, %1, %c0_i32_0 : i32
    scf.if %2 {
      %c0_34 = arith.constant 0 : index
      %c0_35 = arith.constant 0 : index
      %124 = vector.load %arg1[%c0_34, %c0_35] : memref<16x256xf32, #tpu.memory_space<vmem>>, vector<16x256xf32>
      %c0_36 = arith.constant 0 : index
      %c0_37 = arith.constant 0 : index
      %125 = vector.load %arg12[%c0_36, %c0_37] : memref<16x256xf32, #tpu.memory_space<vmem>>, vector<16x256xf32>
      tpu.vector_store %arg12[%c0_36, %c0_37], %124 {strides = array<i32>} : memref<16x256xf32, #tpu.memory_space<vmem>>, vector<16x256xf32>,
    } else {
    }
    %c0 = arith.constant 0 : index
    %c0_1 = arith.constant 0 : index
    %3 = vector.load %arg2[%c0, %c0_1] : memref<16x16xbf16, #tpu.memory_space<vmem>>, vector<16x16xbf16>
    %4 = arith.extf %3 : vector<16x16xbf16> to vector<16x16xf32>
    %c0_2 = arith.constant 0 : index
    %c0_3 = arith.constant 0 : index
    %5 = vector.load %arg12[%c0_2, %c0_3] : memref<16x256xf32, #tpu.memory_space<vmem>>, vector<16x256xf32>
    %6 = arith.truncf %5 : vector<16x256xf32> to vector<16x256xbf16>
    %c0_4 = arith.constant 0 : index
    %c0_5 = arith.constant 0 : index
    %c0_6 = arith.constant 0 : index
    %7 = vector.load %arg3[%c0_4, %c0_5, %c0_6] : memref<1x256x1152xbf16, #tpu.memory_space<vmem>>, vector<1x256x1152xbf16>
    %8 = vector.shape_cast %7 : vector<1x256x1152xbf16> to vector<256x1152xbf16>
    %cst = arith.constant dense<0.000000e+00> : vector<16x1152xf32>
    %9 = tpu.matmul %6, %8, %cst {dimension_numbers = #tpu.dot_dimension_numbers<[1], [0], [0], [1], [0, 0, 1, 1], [], []>} : vector<16x256xbf16>, vector<256x1152xbf16>, vector<16x1152xf32> -> vector<16x1152xf32>
    %10 = vector.extract_strided_slice %9 {offsets = [0, 1024], sizes = [16, 4], strides = [1, 1]} : vector<16x1152xf32> to vector<16x4xf32>
    %11 = vector.extract_strided_slice %9 {offsets = [0, 1028], sizes = [16, 4], strides = [1, 1]} : vector<16x1152xf32> to vector<16x4xf32>
    %12 = tpu.transpose %11, [1, 0] : vector<16x4xf32> -> vector<4x16xf32>
    %13 = vector.extract_strided_slice %9 {offsets = [0, 0], sizes = [16, 1024], strides = [1, 1]} : vector<16x1152xf32> to vector<16x1024xf32>
    %14 = arith.truncf %13 : vector<16x1024xf32> to vector<16x1024xbf16>
    %cst_7 = arith.constant 0.000000e+00 : f32
    %15 = vector.broadcast %cst_7 : f32 to vector<16x256xf32>
    %16 = vector.extract_strided_slice %10 {offsets = [0, 0], sizes = [16, 1], strides = [1, 1]} : vector<16x4xf32> to vector<16x1xf32>
    %17 = vector.extract_strided_slice %12 {offsets = [0, 0], sizes = [1, 16], strides = [1, 1]} : vector<4x16xf32> to vector<1x16xf32>
    %18 = vector.broadcast %16 : vector<16x1xf32> to vector<16x16xf32>
    %19 = vector.broadcast %17 : vector<1x16xf32> to vector<16x16xf32>
    %20 = arith.addf %18, %19 : vector<16x16xf32>
    %cst_8 = arith.constant 2.000000e-01 : f32
    %21 = vector.broadcast %cst_8 : f32 to vector<16x16xf32>
    %22 = arith.mulf %21, %20 : vector<16x16xf32>
    %23 = arith.maximumf %20, %22 : vector<16x16xf32>
    %24 = arith.addf %23, %4 : vector<16x16xf32>
    %cst_9 = arith.constant dense<0xFF800000> : vector<16xf32>
    %25 = vector.multi_reduction <maximumf>, %24, %cst_9 [1] : vector<16x16xf32> to vector<16xf32>
    %26 = vector.shape_cast %25 : vector<16xf32> to vector<16x1xf32>
    %27 = vector.broadcast %26 : vector<16x1xf32> to vector<16x16xf32>
    %28 = arith.subf %24, %27 : vector<16x16xf32>
    %29 = math.exp %28 : vector<16x16xf32>
    %cst_10 = arith.constant dense<0.000000e+00> : vector<16xf32>
    %30 = vector.multi_reduction <add>, %29, %cst_10 [1] : vector<16x16xf32> to vector<16xf32>
    %31 = vector.shape_cast %30 : vector<16xf32> to vector<16x1xf32>
    %32 = tpu.reciprocal %31 {approx = true} : vector<16x1xf32> -> vector<16x1xf32>
    %33 = arith.truncf %29 : vector<16x16xf32> to vector<16x16xbf16>
    %34 = vector.extract_strided_slice %14 {offsets = [0, 0], sizes = [16, 256], strides = [1, 1]} : vector<16x1024xbf16> to vector<16x256xbf16>
    %cst_11 = arith.constant dense<0.000000e+00> : vector<16x256xf32>
    %35 = tpu.matmul %33, %34, %cst_11 {dimension_numbers = #tpu.dot_dimension_numbers<[1], [0], [0], [1], [0, 0, 1, 1], [], []>} : vector<16x16xbf16>, vector<16x256xbf16>, vector<16x256xf32> -> vector<16x256xf32>
    %36 = vector.broadcast %32 : vector<16x1xf32> to vector<16x256xf32>
    %37 = arith.mulf %36, %35 : vector<16x256xf32>
    %38 = arith.addf %15, %37 : vector<16x256xf32>
    %39 = vector.extract_strided_slice %10 {offsets = [0, 1], sizes = [16, 1], strides = [1, 1]} : vector<16x4xf32> to vector<16x1xf32>
    %40 = vector.extract_strided_slice %12 {offsets = [1, 0], sizes = [1, 16], strides = [1, 1]} : vector<4x16xf32> to vector<1x16xf32>
    %41 = vector.broadcast %39 : vector<16x1xf32> to vector<16x16xf32>
    %42 = vector.broadcast %40 : vector<1x16xf32> to vector<16x16xf32>
    %43 = arith.addf %41, %42 : vector<16x16xf32>
    %cst_12 = arith.constant 2.000000e-01 : f32
    %44 = vector.broadcast %cst_12 : f32 to vector<16x16xf32>
    %45 = arith.mulf %44, %43 : vector<16x16xf32>
    %46 = arith.maximumf %43, %45 : vector<16x16xf32>
    %47 = arith.addf %46, %4 : vector<16x16xf32>
    %cst_13 = arith.constant dense<0xFF800000> : vector<16xf32>
    %48 = vector.multi_reduction <maximumf>, %47, %cst_13 [1] : vector<16x16xf32> to vector<16xf32>
    %49 = vector.shape_cast %48 : vector<16xf32> to vector<16x1xf32>
    %50 = vector.broadcast %49 : vector<16x1xf32> to vector<16x16xf32>
    %51 = arith.subf %47, %50 : vector<16x16xf32>
    %52 = math.exp %51 : vector<16x16xf32>
    %cst_14 = arith.constant dense<0.000000e+00> : vector<16xf32>
    %53 = vector.multi_reduction <add>, %52, %cst_14 [1] : vector<16x16xf32> to vector<16xf32>
    %54 = vector.shape_cast %53 : vector<16xf32> to vector<16x1xf32>
    %55 = tpu.reciprocal %54 {approx = true} : vector<16x1xf32> -> vector<16x1xf32>
    %56 = arith.truncf %52 : vector<16x16xf32> to vector<16x16xbf16>
    %57 = vector.extract_strided_slice %14 {offsets = [0, 256], sizes = [16, 256], strides = [1, 1]} : vector<16x1024xbf16> to vector<16x256xbf16>
    %cst_15 = arith.constant dense<0.000000e+00> : vector<16x256xf32>
    %58 = tpu.matmul %56, %57, %cst_15 {dimension_numbers = #tpu.dot_dimension_numbers<[1], [0], [0], [1], [0, 0, 1, 1], [], []>} : vector<16x16xbf16>, vector<16x256xbf16>, vector<16x256xf32> -> vector<16x256xf32>
    %59 = vector.broadcast %55 : vector<16x1xf32> to vector<16x256xf32>
    %60 = arith.mulf %59, %58 : vector<16x256xf32>
    %61 = arith.addf %38, %60 : vector<16x256xf32>
    %62 = vector.extract_strided_slice %10 {offsets = [0, 2], sizes = [16, 1], strides = [1, 1]} : vector<16x4xf32> to vector<16x1xf32>
    %63 = vector.extract_strided_slice %12 {offsets = [2, 0], sizes = [1, 16], strides = [1, 1]} : vector<4x16xf32> to vector<1x16xf32>
    %64 = vector.broadcast %62 : vector<16x1xf32> to vector<16x16xf32>
    %65 = vector.broadcast %63 : vector<1x16xf32> to vector<16x16xf32>
    %66 = arith.addf %64, %65 : vector<16x16xf32>
    %cst_16 = arith.constant 2.000000e-01 : f32
    %67 = vector.broadcast %cst_16 : f32 to vector<16x16xf32>
    %68 = arith.mulf %67, %66 : vector<16x16xf32>
    %69 = arith.maximumf %66, %68 : vector<16x16xf32>
    %70 = arith.addf %69, %4 : vector<16x16xf32>
    %cst_17 = arith.constant dense<0xFF800000> : vector<16xf32>
    %71 = vector.multi_reduction <maximumf>, %70, %cst_17 [1] : vector<16x16xf32> to vector<16xf32>
    %72 = vector.shape_cast %71 : vector<16xf32> to vector<16x1xf32>
    %73 = vector.broadcast %72 : vector<16x1xf32> to vector<16x16xf32>
    %74 = arith.subf %70, %73 : vector<16x16xf32>
    %75 = math.exp %74 : vector<16x16xf32>
    %cst_18 = arith.constant dense<0.000000e+00> : vector<16xf32>
    %76 = vector.multi_reduction <add>, %75, %cst_18 [1] : vector<16x16xf32> to vector<16xf32>
    %77 = vector.shape_cast %76 : vector<16xf32> to vector<16x1xf32>
    %78 = tpu.reciprocal %77 {approx = true} : vector<16x1xf32> -> vector<16x1xf32>
    %79 = arith.truncf %75 : vector<16x16xf32> to vector<16x16xbf16>
    %80 = vector.extract_strided_slice %14 {offsets = [0, 512], sizes = [16, 256], strides = [1, 1]} : vector<16x1024xbf16> to vector<16x256xbf16>
    %cst_19 = arith.constant dense<0.000000e+00> : vector<16x256xf32>
    %81 = tpu.matmul %79, %80, %cst_19 {dimension_numbers = #tpu.dot_dimension_numbers<[1], [0], [0], [1], [0, 0, 1, 1], [], []>} : vector<16x16xbf16>, vector<16x256xbf16>, vector<16x256xf32> -> vector<16x256xf32>
    %82 = vector.broadcast %78 : vector<16x1xf32> to vector<16x256xf32>
    %83 = arith.mulf %82, %81 : vector<16x256xf32>
    %84 = arith.addf %61, %83 : vector<16x256xf32>
    %85 = vector.extract_strided_slice %10 {offsets = [0, 3], sizes = [16, 1], strides = [1, 1]} : vector<16x4xf32> to vector<16x1xf32>
    %86 = vector.extract_strided_slice %12 {offsets = [3, 0], sizes = [1, 16], strides = [1, 1]} : vector<4x16xf32> to vector<1x16xf32>
    %87 = vector.broadcast %85 : vector<16x1xf32> to vector<16x16xf32>
    %88 = vector.broadcast %86 : vector<1x16xf32> to vector<16x16xf32>
    %89 = arith.addf %87, %88 : vector<16x16xf32>
    %cst_20 = arith.constant 2.000000e-01 : f32
    %90 = vector.broadcast %cst_20 : f32 to vector<16x16xf32>
    %91 = arith.mulf %90, %89 : vector<16x16xf32>
    %92 = arith.maximumf %89, %91 : vector<16x16xf32>
    %93 = arith.addf %92, %4 : vector<16x16xf32>
    %cst_21 = arith.constant dense<0xFF800000> : vector<16xf32>
    %94 = vector.multi_reduction <maximumf>, %93, %cst_21 [1] : vector<16x16xf32> to vector<16xf32>
    %95 = vector.shape_cast %94 : vector<16xf32> to vector<16x1xf32>
    %96 = vector.broadcast %95 : vector<16x1xf32> to vector<16x16xf32>
    %97 = arith.subf %93, %96 : vector<16x16xf32>
    %98 = math.exp %97 : vector<16x16xf32>
    %cst_22 = arith.constant dense<0.000000e+00> : vector<16xf32>
    %99 = vector.multi_reduction <add>, %98, %cst_22 [1] : vector<16x16xf32> to vector<16xf32>
    %100 = vector.shape_cast %99 : vector<16xf32> to vector<16x1xf32>
    %101 = tpu.reciprocal %100 {approx = true} : vector<16x1xf32> -> vector<16x1xf32>
    %102 = arith.truncf %98 : vector<16x16xf32> to vector<16x16xbf16>
    %103 = vector.extract_strided_slice %14 {offsets = [0, 768], sizes = [16, 256], strides = [1, 1]} : vector<16x1024xbf16> to vector<16x256xbf16>
    %cst_23 = arith.constant dense<0.000000e+00> : vector<16x256xf32>
    %104 = tpu.matmul %102, %103, %cst_23 {dimension_numbers = #tpu.dot_dimension_numbers<[1], [0], [0], [1], [0, 0, 1, 1], [], []>} : vector<16x16xbf16>, vector<16x256xbf16>, vector<16x256xf32> -> vector<16x256xf32>
    %105 = vector.broadcast %101 : vector<16x1xf32> to vector<16x256xf32>
    %106 = arith.mulf %105, %104 : vector<16x256xf32>
    %107 = arith.addf %84, %106 : vector<16x256xf32>
    %cst_24 = arith.constant 2.500000e-01 : f32
    %108 = vector.broadcast %cst_24 : f32 to vector<16x256xf32>
    %109 = arith.mulf %107, %108 : vector<16x256xf32>
    %c0_25 = arith.constant 0 : index
    %c0_26 = arith.constant 0 : index
    %c0_27 = arith.constant 0 : index
    %110 = vector.load %arg4[%c0_25, %c0_26, %c0_27] : memref<1x1x256xf32, #tpu.memory_space<vmem>>, vector<1x1x256xf32>
    %111 = vector.shape_cast %110 : vector<1x1x256xf32> to vector<1x256xf32>
    %112 = vector.broadcast %111 : vector<1x256xf32> to vector<16x256xf32>
    %113 = arith.addf %109, %112 : vector<16x256xf32>
    %cst_28 = arith.constant 0.000000e+00 : f32
    %114 = vector.broadcast %cst_28 : f32 to vector<16x256xf32>
    %115 = arith.maximumf %113, %114 : vector<16x256xf32>
    %c0_i32_29 = arith.constant 0 : i32
    %116 = arith.cmpi sgt, %arg0, %c0_i32_29 : i32
    %cst_30 = arith.constant 0.000000e+00 : f32
    %117 = vector.broadcast %cst_30 : f32 to vector<16x256xf32>
    %118 = arith.select %116, %5, %117 : vector<16x256xf32>
    %119 = arith.addf %115, %118 : vector<16x256xf32>
    %c0_31 = arith.constant 0 : index
    %c0_32 = arith.constant 0 : index
    %120 = vector.load %arg12[%c0_31, %c0_32] : memref<16x256xf32, #tpu.memory_space<vmem>>, vector<16x256xf32>
    tpu.vector_store %arg12[%c0_31, %c0_32], %119 {strides = array<i32>} : memref<16x256xf32, #tpu.memory_space<vmem>>, vector<16x256xf32>,
    %c2_i32 = arith.constant 2 : i32
    %121 = arith.cmpi eq, %arg0, %c2_i32 : i32
    %122 = arith.extui %121 : i1 to i32
    %c0_i32_33 = arith.constant 0 : i32
    %123 = arith.cmpi ne, %122, %c0_i32_33 : i32
    scf.if %123 {
      %cst_34 = arith.constant dense<0.000000e+00> : vector<256xf32>
      %124 = vector.multi_reduction <add>, %119, %cst_34 [0] : vector<16x256xf32> to vector<256xf32>
      %125 = vector.shape_cast %124 : vector<256xf32> to vector<1x256xf32>
      %cst_35 = arith.constant 1.600000e+01 : f32
      %126 = vector.broadcast %cst_35 : f32 to vector<1x256xf32>
      %127 = arith.divf %125, %126 : vector<1x256xf32>
      %c0_36 = arith.constant 0 : index
      %c0_37 = arith.constant 0 : index
      %128 = vector.load %arg5[%c0_36, %c0_37] : memref<256x256xf32, #tpu.memory_space<vmem>>, vector<256x256xf32>
      %cst_38 = arith.constant dense<0.000000e+00> : vector<1x256xf32>
      %129 = tpu.matmul %127, %128, %cst_38 {dimension_numbers = #tpu.dot_dimension_numbers<[1], [0], [0], [1], [0, 0, 1, 1], [], []>} : vector<1x256xf32>, vector<256x256xf32>, vector<1x256xf32> -> vector<1x256xf32>
      %c0_39 = arith.constant 0 : index
      %c0_40 = arith.constant 0 : index
      %130 = vector.load %arg6[%c0_39, %c0_40] : memref<1x256xf32, #tpu.memory_space<vmem>>, vector<1x256xf32>
      %131 = arith.addf %129, %130 : vector<1x256xf32>
      %cst_41 = arith.constant 0.000000e+00 : f32
      %132 = vector.broadcast %cst_41 : f32 to vector<1x256xf32>
      %133 = arith.maximumf %131, %132 : vector<1x256xf32>
      %c0_42 = arith.constant 0 : index
      %c0_43 = arith.constant 0 : index
      %134 = vector.load %arg7[%c0_42, %c0_43] : memref<256x32xf32, #tpu.memory_space<vmem>>, vector<256x32xf32>
      %cst_44 = arith.constant dense<0.000000e+00> : vector<1x32xf32>
      %135 = tpu.matmul %133, %134, %cst_44 {dimension_numbers = #tpu.dot_dimension_numbers<[1], [0], [0], [1], [0, 0, 1, 1], [], []>} : vector<1x256xf32>, vector<256x32xf32>, vector<1x32xf32> -> vector<1x32xf32>
      %c0_45 = arith.constant 0 : index
      %c0_46 = arith.constant 0 : index
      %136 = vector.load %arg8[%c0_45, %c0_46] : memref<1x32xf32, #tpu.memory_space<vmem>>, vector<1x32xf32>
      %137 = arith.addf %135, %136 : vector<1x32xf32>
      %cst_47 = arith.constant dense<0.000000e+00> : vector<1xf32>
      %138 = vector.multi_reduction <add>, %137, %cst_47 [1] : vector<1x32xf32> to vector<1xf32>
      %139 = vector.shape_cast %138 : vector<1xf32> to vector<1x1xf32>
      %cst_48 = arith.constant 3.200000e+01 : f32
      %140 = vector.broadcast %cst_48 : f32 to vector<1x1xf32>
      %141 = arith.divf %139, %140 : vector<1x1xf32>
      %142 = vector.broadcast %141 : vector<1x1xf32> to vector<1x32xf32>
      %143 = arith.subf %137, %142 : vector<1x32xf32>
      %144 = arith.mulf %143, %143 : vector<1x32xf32>
      %cst_49 = arith.constant dense<0.000000e+00> : vector<1xf32>
      %145 = vector.multi_reduction <add>, %144, %cst_49 [1] : vector<1x32xf32> to vector<1xf32>
      %146 = vector.shape_cast %145 : vector<1xf32> to vector<1x1xf32>
      %cst_50 = arith.constant 3.200000e+01 : f32
      %147 = vector.broadcast %cst_50 : f32 to vector<1x1xf32>
      %148 = arith.divf %146, %147 : vector<1x1xf32>
      %149 = vector.broadcast %141 : vector<1x1xf32> to vector<1x32xf32>
      %150 = arith.subf %137, %149 : vector<1x32xf32>
      %cst_51 = arith.constant 9.99999974E-6 : f32
      %151 = vector.broadcast %cst_51 : f32 to vector<1x1xf32>
      %152 = arith.addf %148, %151 : vector<1x1xf32>
      %153 = math.rsqrt %152 : vector<1x1xf32>
      %154 = vector.broadcast %153 : vector<1x1xf32> to vector<1x32xf32>
      %155 = arith.mulf %150, %154 : vector<1x32xf32>
      %c0_52 = arith.constant 0 : index
      %c0_53 = arith.constant 0 : index
      %156 = vector.load %arg9[%c0_52, %c0_53] : memref<1x32xf32, #tpu.memory_space<vmem>>, vector<1x32xf32>
      %157 = arith.mulf %155, %156 : vector<1x32xf32>
      %c0_54 = arith.constant 0 : index
      %c0_55 = arith.constant 0 : index
      %158 = vector.load %arg10[%c0_54, %c0_55] : memref<1x32xf32, #tpu.memory_space<vmem>>, vector<1x32xf32>
      %159 = arith.addf %157, %158 : vector<1x32xf32>
      %c0_56 = arith.constant 0 : index
      %c0_57 = arith.constant 0 : index
      %160 = vector.load %arg11[%c0_56, %c0_57] : memref<1x32xf32, #tpu.memory_space<vmem>>, vector<1x32xf32>
      tpu.vector_store %arg11[%c0_56, %c0_57], %159 {strides = array<i32>} : memref<1x32xf32, #tpu.memory_space<vmem>>, vector<1x32xf32>,
    } else {
    }
    return
  }
  func.func @transform_0(%arg0: i32) -> (i32, i32) {
    %c0_i32 = arith.constant 0 : i32
    %c0_i32_0 = arith.constant 0 : i32
    %c0_i32_1 = arith.constant 0 : i32
    return %c0_i32, %c0_i32_0 : i32, i32
  }
  func.func @transform_1(%arg0: i32) -> (i32, i32) {
    %c0_i32 = arith.constant 0 : i32
    %c0_i32_0 = arith.constant 0 : i32
    %c0_i32_1 = arith.constant 0 : i32
    return %c0_i32, %c0_i32_0 : i32, i32
  }
  func.func @transform_2(%arg0: i32) -> (i32, i32, i32) {
    %c0_i32 = arith.constant 0 : i32
    %c0_i32_0 = arith.constant 0 : i32
    %c0_i32_1 = arith.constant 0 : i32
    return %arg0, %c0_i32, %c0_i32_0 : i32, i32, i32
  }
  func.func @transform_3(%arg0: i32) -> (i32, i32, i32) {
    %c0_i32 = arith.constant 0 : i32
    %c0_i32_0 = arith.constant 0 : i32
    %c0_i32_1 = arith.constant 0 : i32
    return %arg0, %c0_i32, %c0_i32_0 : i32, i32, i32
  }
  func.func @transform_4(%arg0: i32) -> (i32, i32) {
    %c0_i32 = arith.constant 0 : i32
    %c0_i32_0 = arith.constant 0 : i32
    %c0_i32_1 = arith.constant 0 : i32
    return %c0_i32, %c0_i32_0 : i32, i32
  }
  func.func @transform_5(%arg0: i32) -> (i32, i32) {
    %c0_i32 = arith.constant 0 : i32
    %c0_i32_0 = arith.constant 0 : i32
    %c0_i32_1 = arith.constant 0 : i32
    return %c0_i32, %c0_i32_0 : i32, i32
  }
  func.func @transform_6(%arg0: i32) -> (i32, i32) {
    %c0_i32 = arith.constant 0 : i32
    %c0_i32_0 = arith.constant 0 : i32
    %c0_i32_1 = arith.constant 0 : i32
    return %c0_i32, %c0_i32_0 : i32, i32
  }
  func.func @transform_7(%arg0: i32) -> (i32, i32) {
    %c0_i32 = arith.constant 0 : i32
    %c0_i32_0 = arith.constant 0 : i32
    %c0_i32_1 = arith.constant 0 : i32
    return %c0_i32, %c0_i32_0 : i32, i32
  }
  func.func @transform_8(%arg0: i32) -> (i32, i32) {
    %c0_i32 = arith.constant 0 : i32
    %c0_i32_0 = arith.constant 0 : i32
    %c0_i32_1 = arith.constant 0 : i32
    return %c0_i32, %c0_i32_0 : i32, i32
  }
  func.func @transform_9(%arg0: i32) -> (i32, i32) {
    %c0_i32 = arith.constant 0 : i32
    %c0_i32_0 = arith.constant 0 : i32
    %c0_i32_1 = arith.constant 0 : i32
    return %c0_i32, %c0_i32_0 : i32, i32
  }
  func.func @transform_10(%arg0: i32) -> (i32, i32) {
    %c0_i32 = arith.constant 0 : i32
    %c0_i32_0 = arith.constant 0 : i32
    %c0_i32_1 = arith.constant 0 : i32
    return %c0_i32, %c0_i32_0 : i32, i32
  }
}

</mosaic_0001>

<bundles_post_ra>
// kernel: gat_graph_encoder_forward.1
= control target key start
LH: loop header
LB: loop body
LE: loop exit
PB: predicated region body
PF: predicated region fallthrough
CT: control target
= control target key end

     0   :  { %s4382_s0 = inlined_call_operand.hbm [shape: f32[16,256], index: 0, kind: input, shape index: {}]   ;;  %s4383_s1 = inlined_call_operand.hbm [shape: bf16[16,16], index: 1, kind: input, shape index: {}]   ;;  %s4384_s2 = inlined_call_operand.hbm [shape: bf16[3,256,1152], index: 2, kind: input, shape index: {}]   ;;  %s4385_s3 = inlined_call_operand.hbm [shape: f32[3,1,256], index: 3, kind: input, shape index: {}]   ;;  %s4386_s4 = inlined_call_operand.hbm [shape: f32[256,256], index: 4, kind: input, shape index: {}]   ;;  %s4387_s5 = inlined_call_operand.hbm [shape: f32[1,256], index: 5, kind: input, shape index: {}]   ;;  %s4388_s6 = inlined_call_operand.hbm [shape: f32[256,32], index: 6, kind: input, shape index: {}]   ;;  %s4389_s7 = inlined_call_operand.hbm [shape: f32[1,32], index: 7, kind: input, shape index: {}]   ;;  %s4390_s8 = inlined_call_operand.hbm [shape: f32[1,32], index: 8, kind: input, shape index: {}]   ;;  %s4391_s9 = inlined_call_operand.hbm [shape: f32[1,32], index: 9, kind: input, shape index: {}]   ;;  %s4392_s10 = inlined_call_operand.hbm [shape: f32[1,32], index: 10, kind: output, shape index: {}]  }
   0x1   :  { %4406 = sst [smem:[#allocation29_spill]] %s4382_s0 }
   0x2   :  { %4407 = sst [smem:[#allocation30_spill]] %s4383_s1 }
   0x3   :  { %4408 = sst [smem:[#allocation31_spill]] %s4384_s2 }
   0x4   :  { %4409 = sst [smem:[#allocation32_spill]] %s4386_s4 }
   0x5   :  { %4410 = sst [smem:[#allocation33_spill]] %s4387_s5 }
   0x6   :  { %4411 = sst [smem:[#allocation34_spill]] %s4389_s7 }
   0x7   :  { %4412 = sst [smem:[#allocation35_spill]] %s4392_s10 }
   0x8   :  { %15 = vsyncpa [#allocation4], 0 }
   0x9   :  { %16 = vsyncpa [#allocation7], 0 }
   0xa   :  { %17 = vsyncpa [#allocation12], 0 }
   0xb   :  { %18 = vsyncpa [#allocation15], 0 }
   0xc   :  { %19 = vsyncpa [#allocation18], 0 }
   0xd   :  { %20 = vsyncpa [#allocation5], 0  ;;  %s3746_s13 = smov 0   ;;  %s3748_s14 = smov 0  }
   0xe   :  { %s3750_s15 = smov 0   ;;  %s3752_s16 = smov 0  }
   0xf LB: > { %s3667_s17 = smov [#allocation3]   ;;  %s3767_s19 = sadd.s32 4294967295, %s3665_s16   ;;  %s3665_s16 = sphi %s3752_s16, %s4455_s16   ;;  %s3661_s15 = sphi %s3750_s15, %s4454_s15   ;;  %s3657_s14 = sphi %s3748_s14, %s4453_s14   ;;  %s3653_s13 = sphi %s3746_s13, %s4452_s13  }
  0x10   : > { %s284_s18 = sshll.u32 %s3667_s17, 4  ;;  %p2555_p0 = scmp.ge.s32.totalorder %s3665_s16, 1  ;;  %s3773_s18 = int_to_ptr.vmem [resolvable:$true] %s284_s18 }
  0x11   : > { %p4396_p1 = scmp.eq.s32.totalorder %s3767_s19, 0  ;;  %p272_p2 = scmp.lt.s32.totalorder %s3665_s16, 4 }
  0x12   : > { %s3668_s21 = smov [#allocation6]   ;;  %s3669_s24 = smov [#allocation11]  }
  0x13   : > { %p3775_p4 = pnand %p2555_p0, %p272_p2  ;;  %s297_s22 = sshll.u32 %s3668_s21, 4  ;;  %s3787_s22 = int_to_ptr.vmem [resolvable:$true] %s297_s22 }
  0x14   : > { %s3789_s25 = sshll.u32 %s3669_s24, 4  ;;  %s4416_s0 = sld [smem:[#allocation29_spill]]  ;;  %s325_s25 = int_to_ptr.vmem [resolvable:$true] %s3789_s25 }
  0x15   : > { %s4413_s20 = scalar_select %p3775_p4, 1, 0 }
  0x16   : > { %p2934_p5 = pneg %p3775_p4 }
  0x17   : > { %4414 = sst [smem:[#allocation28_spill]] %s4413_s20 }
  0x18   : > { %p3783_p6 = pnand %p2934_p5, %p4396_p1 }
  0x1a   : > { %s4415_s23 = scalar_select %p3783_p6, 1, 0 }
  0x1b   : > { %s3293_s28 = scalar_lea.hbm %s4416_s0, 512  ;;  %p3799_p8 = pneg %p3783_p6 }
  0x1c   : > { %p3294_p7 = scmp.ne.s32.totalorder %s4416_s0, %s3293_s28  ;;  %p3300_p11 = scmp.lt.u32.totalorder %s3293_s28, %s4416_s0 }
  0x1e   : > { %p3296_p9 = pnand %p3799_p8, %p3294_p7 }
  0x20   : > { %p3297_p10 = pneg %p3296_p9 }
  0x22   : > { %p3302_p12 = pnand %p3300_p11, %p3297_p10 }
  0x24   : > { %3305 = shalt.err (!%p3302_p12)
}
  0x25   : > { %s3306_s21 = scalar_lea.vmem %s3773_s18, 512  ;;  %p3314_p5 = scmp.lt.s32.totalorder %s3773_s18, %s3773_s18 }
  0x26   : > { %p3307_p13 = scmp.ne.s32.totalorder %s3773_s18, %s3306_s21  ;;  %p3315_p3 = scmp.lt.s32.totalorder %s3306_s21, %s3306_s21 }
  0x28   : > { %p3309_p0 = pnand %p3307_p13, %p3799_p8  ;;  %p3316_p7 = por %p3315_p3, %p3314_p5 }
  0x2a   : > { %p3310_p2 = pneg %p3309_p0 }
  0x2c   : > { %p3317_p9 = pnand %p3316_p7, %p3310_p2 }
  0x2e   : > { %3320 = shalt.err (!%p3317_p9)
}
  0x2f   : > { %s4395_s24 = smov 256   ;;  %s4399_s26 = smov 16  }
  0x30   : > { %2937 = dma.hbm_to_vmem [thread:$0]  (!%p3783_p6), %s4416_s0, 512, %s3773_s18, [#allocation4], %s4395_s24, %s4395_s24, %s4399_s26  }
  0x31   : > { %s4418_s1 = sld [smem:[#allocation30_spill]] }
  0x37   : > { %s3321_s12 = scalar_lea.hbm %s4418_s1, 128 }
  0x38   : > { %p3322_p3 = scmp.ne.s32.totalorder %s4418_s1, %s3321_s12  ;;  %p3328_p12 = scmp.lt.u32.totalorder %s3321_s12, %s4418_s1 }
  0x3a   : > { %p3324_p10 = pnand %p3322_p3, %p3799_p8 }
  0x3c   : > { %p3325_p11 = pneg %p3324_p10 }
  0x3e   : > { %p3330_p13 = pnand %p3328_p12, %p3325_p11 }
  0x40   : > { %3333 = shalt.err (!%p3330_p13)
}
  0x41   : > { %s3334_s18 = scalar_lea.vmem %s3787_s22, 128  ;;  %p3342_p7 = scmp.lt.s32.totalorder %s3787_s22, %s3787_s22 }
  0x42   : > { %p3335_p0 = scmp.ne.s32.totalorder %s3787_s22, %s3334_s18  ;;  %p3343_p9 = scmp.lt.s32.totalorder %s3334_s18, %s3334_s18 }
  0x44   : > { %p3337_p2 = pnand %p3335_p0, %p3799_p8  ;;  %p3344_p3 = por %p3343_p9, %p3342_p7 }
  0x46   : > { %p3338_p5 = pneg %p3337_p2 }
  0x48   : > { %p3345_p10 = pnand %p3344_p3, %p3338_p5 }
  0x4a   : > { %3348 = shalt.err (!%p3345_p10)
}
  0x4b   : > { %s3672_s27 = smov 64   ;;  %s3673_s10 = smov 4  }
  0x4c   : > { %2940 = dma.hbm_to_vmem [thread:$0]  (!%p3783_p6), %s4418_s1, 128, %s3787_s22, [#allocation7], %s3672_s27, %s3672_s27, %s3673_s10  }
  0x4d   : > { %s4419_s5 = sld [smem:[#allocation33_spill]] }
  0x53   : > { %s3349_s12 = scalar_lea.hbm %s4419_s5, 32 }
  0x54   : > { %p3350_p11 = scmp.ne.s32.totalorder %s4419_s5, %s3349_s12  ;;  %p3356_p0 = scmp.lt.u32.totalorder %s3349_s12, %s4419_s5 }
  0x56   : > { %p3352_p12 = pnand %p3350_p11, %p3799_p8 }
  0x58   : > { %p3353_p13 = pneg %p3352_p12 }
  0x5a   : > { %p3358_p2 = pnand %p3356_p0, %p3353_p13 }
  0x5c   : > { %3361 = shalt.err (!%p3358_p2)
}
  0x5d   : > { %s3362_s20 = scalar_lea.vmem %s325_s25, 32  ;;  %p3370_p3 = scmp.lt.s32.totalorder %s325_s25, %s325_s25 }
  0x5e   : > { %p3363_p5 = scmp.ne.s32.totalorder %s325_s25, %s3362_s20  ;;  %p3371_p10 = scmp.lt.s32.totalorder %s3362_s20, %s3362_s20 }
  0x60   : > { %p3365_p7 = pnand %p3363_p5, %p3799_p8  ;;  %p3372_p1 = por %p3371_p10, %p3370_p3 }
  0x62   : > { %p3366_p9 = pneg %p3365_p7 }
  0x64   : > { %p3373_p4 = pnand %p3372_p1, %p3366_p9 }
  0x66   : > { %3376 = shalt.err (!%p3373_p4)
}
  0x67   : > { %2946 = dma.hbm_to_vmem [thread:$0]  (!%p3783_p6), %s4419_s5, 32, %s325_s25, [#allocation12]  }
  0x68   : > { %s3674_s24 = smov [#allocation14]   ;;  %s4420_s7 = sld [smem:[#allocation34_spill]] }
  0x69   : > { %s348_s10 = sshll.u32 %s3674_s24, 4  ;;  %s349_s10 = int_to_ptr.vmem [resolvable:$true] %s348_s10 }
  0x6e   : > { %s3377_s30 = scalar_lea.hbm %s4420_s7, 16 }
  0x6f   : > { %p3378_p11 = scmp.ne.s32.totalorder %s4420_s7, %s3377_s30  ;;  %p3384_p12 = scmp.lt.u32.totalorder %s3377_s30, %s4420_s7 }
  0x71   : > { %p3380_p1 = pnand %p3378_p11, %p3799_p8 }
  0x73   : > { %p3381_p4 = pneg %p3380_p1 }
  0x75   : > { %p3386_p13 = pnand %p3384_p12, %p3381_p4 }
  0x77   : > { %3389 = shalt.err (!%p3386_p13)
}
  0x78   : > { %s3390_s25 = scalar_lea.vmem %s349_s10, 16  ;;  %s3397_s20 = scalar_lea.vmem %s349_s10, 32 }
  0x79   : > { %p3391_p0 = scmp.ne.s32.totalorder %s349_s10, %s3390_s25  ;;  %p3398_p7 = scmp.lt.s32.totalorder %s349_s10, %s349_s10 }
  0x7a   : > { %p3399_p9 = scmp.lt.s32.totalorder %s3397_s20, %s3390_s25 }
  0x7b   : > { %p3393_p2 = pnand %p3391_p0, %p3799_p8 }
  0x7c   : > { %p3400_p3 = por %p3399_p9, %p3398_p7 }
  0x7d   : > { %p3394_p5 = pneg %p3393_p2 }
  0x7f   : > { %p3401_p10 = pnand %p3400_p3, %p3394_p5 }
  0x81   : > { %3404 = shalt.err (!%p3401_p10)
}
  0x82   : > { %2952 = dma.hbm_to_vmem [thread:$0]  (!%p3783_p6), %s4420_s7, 16, %s349_s10, [#allocation15]  }
  0x83   : > { %s3884_s24 = sadd.s32 1, %s3665_s16   ;;  %s75_s28 = sadd.s32 1, %s3661_s15 }
  0x84   : > { %s72_s29 = ssub.s32 %s3665_s16, %s3884_s24  ;;  %p82_p11 = scmp.ne.s32.totalorder %s3661_s15, %s3657_s14 }
  0x85   : > { %p73_p1 = scmp.eq.s32.totalorder %s72_s29, 0  ;;  %p83_p4 = scmp.eq.s32.totalorder %s3665_s16, 0 }
  0x86   : > { %p88_p12 = scmp.ne.s32.totalorder %s3657_s14, %s3653_s13  ;;  %p2974_p13 = scmp.lt.s32.totalorder %s3665_s16, 3 }
  0x87   : > { %s3896_s30 = scalar_select %p73_p1, %s3661_s15, %s75_s28  }
  0x88   : > { %p84_p0 = por %p83_p4, %p82_p11  ;;  %p4421_p2 = scmp.eq.s32.totalorder %s3767_s19, 0 }
  0x89   : > { %s381_s17 = sand.u32 1, %s3665_s16   ;;  %s4398_s10 = sand.u32 1, %s3661_s15  }
  0x8a   : > { %p3900_p5 = por %p4421_p2, %p88_p12  ;;  %s2891_s21 = smul.u32 1152, %s4398_s10 }
  0x8b   : > { %s2892_s18 = smul.u32 18432, %s3665_s16  ;;  %p3909_p7 = pnand %p2974_p13, %p84_p0 }
  0x8c   : > { %s4422_s12 = scalar_select %p3900_p5, 1, 0 }
  0x8d   : > { %s4423_s25 = scalar_select %p3909_p7, 1, 0 }
  0x8e   : > { %s4424_s2 = sld [smem:[#allocation31_spill]]  ;;  %s385_s27 = scalar_lea.vmem [#allocation8], %s2891_s21 }
  0x8f   : > { %s392_s28 = sshll.u32 %s385_s27, 4  ;;  %s3920_s29 = scalar_lea.sflag [#allocation4], %s381_s17  ;;  %s3918_s28 = int_to_ptr.vmem [resolvable:$true] %s392_s28 }
  0x90   : > { %p4403_p3 = pneg %p3909_p7 }
  0x94   : > { %s3916_s22 = scalar_lea.hbm %s4424_s2, %s2892_s18  ;;  %s3410_s13 = scalar_lea.hbm %s4424_s2, 55296 }
  0x95   : > { %s3405_s10 = scalar_lea.hbm %s3916_s22, 18432  ;;  %p3411_p1 = scmp.lt.u32.totalorder %s3916_s22, %s4424_s2 }
  0x96   : > { %p3406_p9 = scmp.ne.s32.totalorder %s3916_s22, %s3405_s10  ;;  %p3412_p4 = scmp.lt.u32.totalorder %s3410_s13, %s3405_s10 }
  0x97   : > { %p3414_p13 = scmp.lt.u32.totalorder %s3405_s10, %s3916_s22 }
  0x98   : > { %p3408_p10 = pnand %p4403_p3, %p3406_p9  ;;  %p3413_p12 = por %p3412_p4, %p3411_p1 }
  0x9a   : > { %p3409_p11 = pneg %p3408_p10  ;;  %p3415_p0 = por %p3414_p13, %p3413_p12 }
  0x9c   : > { %p3416_p2 = pnand %p3415_p0, %p3409_p11 }
  0x9e   : > { %3419 = shalt.err (!%p3416_p2)
}
  0x9f   : > { %s3420_s17 = scalar_lea.vmem %s3918_s28, 18432  ;;  %s3675_s21 = smov [#allocation8]  }
  0xa0   : > { %p3421_p9 = scmp.ne.s32.totalorder %s3918_s28, %s3420_s17  ;;  %s3425_s27 = sshll.u32 %s3675_s21, 4  ;;  %s3426_s27 = int_to_ptr.vmem [resolvable:$false] %s3425_s27 }
  0xa1   : > { %s3427_s0 = scalar_lea.vmem %s3426_s27, 36864  ;;  %p3428_p6 = scmp.lt.s32.totalorder %s3918_s28, %s3426_s27 }
  0xa2   : > { %p3423_p10 = pnand %p3421_p9, %p4403_p3  ;;  %p3429_p1 = scmp.lt.s32.totalorder %s3427_s0, %s3420_s17 }
  0xa4   : > { %p3424_p5 = pneg %p3423_p10  ;;  %p3430_p4 = por %p3429_p1, %p3428_p6 }
  0xa6   : > { %p3431_p12 = pnand %p3430_p4, %p3424_p5 }
  0xa8   : > { %3434 = shalt.err (!%p3431_p12)
}
  0xa9   : > { %s3676_s26 = smov 576   ;;  %s3677_s10 = smov 36  }
  0xaa   : > { %2962 = dma.hbm_to_vmem [thread:$0]  (!%p3909_p7), %s3916_s22, 18432, %s3918_s28, %s3920_s29, %s3676_s26, %s3676_s26, %s3677_s10  }
  0xab   : > { %s3678_s18 = smov [#allocation10]   ;;  %s3679_s13 = smov [#allocation13]  }
  0xac   : > { %s310_s20 = sshll.u32 %s3678_s18, 4  ;;  %s334_s21 = sshll.u32 %s3679_s13, 4  ;;  %s311_s20 = int_to_ptr.vmem [resolvable:$true] %s310_s20  ;;  %s335_s21 = int_to_ptr.vmem [resolvable:$true] %s334_s21 }
  0xad   : > { %s4425_s4 = sld [smem:[#allocation32_spill]] }
  0xb3   : > { %s3435_s17 = scalar_lea.hbm %s4425_s4, 8192 }
  0xb4   : > { %p3436_p6 = scmp.ne.s32.totalorder %s4425_s4, %s3435_s17  ;;  %p3442_p13 = scmp.lt.u32.totalorder %s3435_s17, %s4425_s4 }
  0xb6   : > { %p3438_p5 = pnand %p3436_p6, %p3799_p8 }
  0xb8   : > { %p3439_p11 = pneg %p3438_p5 }
  0xba   : > { %p3444_p0 = pnand %p3442_p13, %p3439_p11 }
  0xbc   : > { %3447 = shalt.err (!%p3444_p0)
}
  0xbd   : > { %s3448_s22 = scalar_lea.vmem %s311_s20, 8192  ;;  %p3456_p1 = scmp.lt.s32.totalorder %s311_s20, %s311_s20 }
  0xbe   : > { %p3449_p2 = scmp.ne.s32.totalorder %s311_s20, %s3448_s22  ;;  %p3457_p4 = scmp.lt.s32.totalorder %s3448_s22, %s3448_s22 }
  0xc0   : > { %p3451_p9 = pnand %p3449_p2, %p3799_p8  ;;  %p3458_p12 = por %p3457_p4, %p3456_p1 }
  0xc2   : > { %p3452_p10 = pneg %p3451_p9 }
  0xc4   : > { %p3459_p3 = pnand %p3458_p12, %p3452_p10 }
  0xc6   : > { %3462 = shalt.err (!%p3459_p3)
}
  0xc7   : > { %p4426_p6 = scmp.ne.s32.totalorder %s4415_s23, 0  ;;  %s4427_s1 = smov 16  }
  0xc8   : > { %s4428_s2 = smov 256   ;;  %s3463_s10 = scalar_lea.hbm %s4388_s6, 4096 }
  0xc9   : > { %2943 = dma.hbm_to_vmem [thread:$0]  (!%p4426_p6), %s4425_s4, 8192, %s311_s20, [#allocation7], %s4428_s2, %s4428_s2, %s4427_s1  }
  0xca   : > { %p3464_p5 = scmp.ne.s32.totalorder %s4388_s6, %s3463_s10  ;;  %p3470_p13 = scmp.lt.u32.totalorder %s3463_s10, %s4388_s6 }
  0xcc   : > { %p3466_p3 = pnand %p3464_p5, %p3799_p8 }
  0xce   : > { %p3467_p11 = pneg %p3466_p3 }
  0xd0   : > { %p3472_p0 = pnand %p3470_p13, %p3467_p11 }
  0xd2   : > { %3475 = shalt.err (!%p3472_p0)
}
  0xd3   : > { %s3476_s0 = scalar_lea.vmem %s335_s21, 4096  ;;  %p3484_p1 = scmp.lt.s32.totalorder %s335_s21, %s335_s21 }
  0xd4   : > { %p3477_p2 = scmp.ne.s32.totalorder %s335_s21, %s3476_s0  ;;  %p3485_p4 = scmp.lt.s32.totalorder %s3476_s0, %s3476_s0 }
  0xd6   : > { %p3479_p9 = pnand %p3477_p2, %p3799_p8  ;;  %p3486_p12 = por %p3485_p4, %p3484_p1 }
  0xd8   : > { %p3480_p10 = pneg %p3479_p9 }
  0xda   : > { %p3487_p7 = pnand %p3486_p12, %p3480_p10 }
  0xdc   : > { %3490 = shalt.err (!%p3487_p7)
}
  0xdd   : > { %s3680_s20 = smov 128   ;;  %s3681_s22 = smov 8  }
  0xde   : > { %2949 = dma.hbm_to_vmem [thread:$0]  (!%p4426_p6), %s4388_s6, 4096, %s335_s21, [#allocation12], %s3680_s20, %s3680_s20, %s3681_s22  }
  0xdf   : > { %s3682_s5 = smov [#allocation16]   ;;  %s3683_s28 = smov [#allocation17]  }
  0xe0   : > { %s359_s7 = sshll.u32 %s3682_s5, 4  ;;  %s370_s26 = sshll.u32 %s3683_s28, 4  ;;  %s360_s7 = int_to_ptr.vmem [resolvable:$true] %s359_s7  ;;  %s371_s26 = int_to_ptr.vmem [resolvable:$true] %s370_s26 }
  0xe1   : > { %s3491_s13 = scalar_lea.hbm %s4390_s8, 16 }
  0xe2   : > { %p3492_p7 = scmp.ne.s32.totalorder %s4390_s8, %s3491_s13  ;;  %p3498_p11 = scmp.lt.u32.totalorder %s3491_s13, %s4390_s8 }
  0xe4   : > { %p3494_p5 = pnand %p3492_p7, %p3799_p8 }
  0xe6   : > { %p3495_p3 = pneg %p3494_p5 }
  0xe8   : > { %p3500_p13 = pnand %p3498_p11, %p3495_p3 }
  0xea   : > { %3503 = shalt.err (!%p3500_p13)
}
  0xeb   : > { %s3504_s21 = scalar_lea.vmem %s360_s7, 16  ;;  %s3511_s20 = scalar_lea.vmem %s360_s7, 32 }
  0xec   : > { %p3505_p0 = scmp.ne.s32.totalorder %s360_s7, %s3504_s21  ;;  %p3512_p10 = scmp.lt.s32.totalorder %s360_s7, %s360_s7 }
  0xed   : > { %p3513_p1 = scmp.lt.s32.totalorder %s3511_s20, %s3504_s21 }
  0xee   : > { %p3507_p2 = pnand %p3505_p0, %p3799_p8 }
  0xef   : > { %p3514_p4 = por %p3513_p1, %p3512_p10 }
  0xf0   : > { %p3508_p9 = pneg %p3507_p2 }
  0xf2   : > { %p3515_p12 = pnand %p3514_p4, %p3508_p9 }
  0xf4   : > { %3518 = shalt.err (!%p3515_p12)
}
  0xf5   : > { %2955 = dma.hbm_to_vmem [thread:$0]  (!%p4426_p6), %s4390_s8, 16, %s360_s7, [#allocation15]  }
  0xf6   : > { %s4429_s4 = sand.u32 1, %s3661_s15   ;;  %s3519_s10 = scalar_lea.hbm %s4391_s9, 16 }
  0xf7   : > { %s2566_s2 = sshll.u32 %s4429_s4, 1  ;;  %p3520_p7 = scmp.ne.s32.totalorder %s4391_s9, %s3519_s10 }
  0xf8   : > { %p3526_p11 = scmp.lt.u32.totalorder %s3519_s10, %s4391_s9 }
  0xf9   : > { %p3522_p5 = pnand %p3520_p7, %p3799_p8 }
  0xfb   : > { %p3523_p3 = pneg %p3522_p5 }
  0xfd   : > { %p3528_p13 = pnand %p3526_p11, %p3523_p3 }
  0xff   : > { %3531 = shalt.err (!%p3528_p13)
}
 0x100   : > { %s3532_s7 = scalar_lea.vmem %s371_s26, 16  ;;  %s3539_s0 = scalar_lea.vmem %s371_s26, 32 }
 0x101   : > { %p3533_p0 = scmp.ne.s32.totalorder %s371_s26, %s3532_s7  ;;  %p3540_p10 = scmp.lt.s32.totalorder %s371_s26, %s371_s26 }
 0x102   : > { %p3541_p1 = scmp.lt.s32.totalorder %s3539_s0, %s3532_s7 }
 0x103   : > { %p3535_p2 = pnand %p3533_p0, %p3799_p8 }
 0x104   : > { %p3542_p4 = por %p3541_p1, %p3540_p10 }
 0x105   : > { %p3536_p9 = pneg %p3535_p2 }
 0x107   : > { %p3543_p12 = pnand %p3542_p4, %p3536_p9 }
 0x109   : > { %3546 = shalt.err (!%p3543_p12)
}
 0x10a   : > { %2958 = dma.hbm_to_vmem [thread:$0]  (!%p4426_p6), %s4391_s9, 16, %s371_s26, [#allocation18]  }
 0x10b   : > { %s2733_s22 = sshll.u32 %s3665_s16, 5  ;;  %s406_s5 = scalar_lea.vmem [#allocation9], %s2566_s2 }
 0x10c   : > { %s4029_s11 = scalar_lea.hbm %s4385_s3, %s2733_s22  ;;  %s414_s28 = sshll.u32 %s406_s5, 4  ;;  %s415_s28 = int_to_ptr.vmem [resolvable:$true] %s414_s28 }
 0x10d   : > { %s3547_s23 = scalar_lea.hbm %s4029_s11, 32  ;;  %p4430_p7 = scmp.ne.s32.totalorder %s4423_s25, 0 }
 0x10e   : > { %p3548_p8 = scmp.ne.s32.totalorder %s4029_s11, %s3547_s23  ;;  %s3552_s10 = scalar_lea.hbm %s4385_s3, 96 }
 0x10f   : > { %p4431_p5 = pneg %p4430_p7  ;;  %p3553_p6 = scmp.lt.u32.totalorder %s4029_s11, %s4385_s3 }
 0x110   : > { %p3554_p13 = scmp.lt.u32.totalorder %s3552_s10, %s3547_s23  ;;  %p3556_p2 = scmp.lt.u32.totalorder %s3547_s23, %s4029_s11 }
 0x111   : > { %p3550_p3 = pnand %p3548_p8, %p4431_p5 }
 0x112   : > { %p3555_p0 = por %p3554_p13, %p3553_p6 }
 0x113   : > { %p3551_p11 = pneg %p3550_p3 }
 0x114   : > { %p3557_p9 = por %p3556_p2, %p3555_p0 }
 0x116   : > { %p3558_p10 = pnand %p3557_p9, %p3551_p11 }
 0x118   : > { %3561 = shalt.err (!%p3558_p10)
}
 0x119   : > { %s3562_s2 = scalar_lea.vmem %s415_s28, 32  ;;  %p4432_p4 = pmov %p4431_p5 }
 0x11a   : > { %p3563_p1 = scmp.ne.s32.totalorder %s415_s28, %s3562_s2  ;;  %s3684_s27 = smov [#allocation9]  }
 0x11b   : > { %s3567_s17 = sshll.u32 %s3684_s27, 4  ;;  %s3568_s17 = int_to_ptr.vmem [resolvable:$false] %s3567_s17 }
 0x11c   : > { %p3565_p12 = pnand %p3563_p1, %p4432_p4  ;;  %s3569_s7 = scalar_lea.vmem %s3568_s17, 64 }
 0x11d   : > { %p3570_p5 = scmp.lt.s32.totalorder %s415_s28, %s3568_s17  ;;  %p3571_p3 = scmp.lt.s32.totalorder %s3569_s7, %s3562_s2 }
 0x11e   : > { %p3566_p8 = pneg %p3565_p12 }
 0x11f   : > { %p3572_p6 = por %p3571_p3, %p3570_p5 }
 0x121   : > { %p3573_p13 = pnand %p3572_p6, %p3566_p8 }
 0x123   : > { %3576 = shalt.err (!%p3573_p13)
}
 0x124   : > { %2965 = dma.hbm_to_vmem [thread:$0]  (!%p4430_p7), %s4029_s11, 32, %s415_s28, %s3920_s29  }
 0x125   : > { %s4433_s0 = sld [smem:[#allocation28_spill]] }
 0x12b   : > { %p4434_p11 = scmp.ne.s32.totalorder %s4433_s0, 0 }
 0x12c   : > { %p4435_p0 = scmp.eq.s32.totalorder (!%p4434_p11), %s3767_s19, 0 }
 0x12d   : > { %423 = sbr.rel (%p4434_p11) target bundleno = 2209 (0x8a1), region = 60 }
 0x134   : > { %3620 = dma.done.wait (%p4435_p0), [#allocation4], 512   ;;  %p4436_p2 = pmov %p4435_p0 }
 0x135   : > { %p4437_p9 = pmov %p4435_p0 }
 0x136   : > { %3622 = vsyncadd (%p4436_p2), [#allocation4], 4294966784 }
 0x137   : > { %3624 = dma.done.wait (%p4437_p9), [#allocation7], 128   ;;  %p4438_p10 = pmov %p4435_p0 }
 0x138   : > { %s433_s25 = sand.u32 1, %s3767_s19   ;;  %s435_s29 = sand.u32 1, %s3657_s14  }
 0x139   : > { %3626 = vsyncadd (%p4438_p10), [#allocation7], 4294967168  ;;  %s2893_s21 = smul.u32 1152, %s435_s29  ;;  %s434_s20 = scalar_lea.sflag [#allocation4], %s433_s25 }
 0x13a   : > { %p4439_p7 = scmp.ne.s32.totalorder %s4422_s12, 0 }
 0x13b   : > { %s4063_s22 = scalar_lea.vmem [#allocation8], %s2893_s21 }
 0x13c   : > { %3628 = dma.done.wait (%p4439_p7), %s434_s20, 18464  }
 0x13d   : > { %3630 = vsyncadd (%p4439_p7), %s434_s20, 4294948832  ;;  %s4069_s1 = sshll.u32 %s435_s29, 1  ;;  %p4440_p1 = pmov %p4435_p0 }
 0x13e   : > { %s446_s4 = scalar_lea.vmem [#allocation9], %s4069_s1 }
 0x13f   : > { %3632 = dma.done.wait (%p4440_p1), [#allocation7], 8192   ;;  %p4441_p4 = pmov %p4435_p0 }
 0x140   : > { %p4442_p12 = pmov %p4435_p0 }
 0x141   : > { %3634 = vsyncadd (%p4441_p4), [#allocation7], 4294959104 }
 0x142   : > { %3636 = dma.done.wait (%p4442_p12), [#allocation12], 4128   ;;  %p4443_p8 = pmov %p4435_p0 }
 0x143   : > { %p4444_p5 = pmov %p4435_p0 }
 0x144   : > { %3638 = vsyncadd (%p4443_p8), [#allocation12], 4294963168 }
 0x145   : > { %3640 = dma.done.wait (%p4444_p5), [#allocation15], 32   ;;  %p4445_p3 = pmov %p4435_p0 }
 0x146   : > { %p4446_p6 = pmov %p4435_p0 }
 0x147   : > { %3642 = vsyncadd (%p4445_p3), [#allocation15], 4294967264 }
 0x148   : > { %3644 = dma.done.wait (%p4446_p6), [#allocation18], 16   ;;  %p4447_p13 = pmov %p4435_p0 }
 0x149   : > { %p4448_p11 = scmp.ne.s32.totalorder %s3767_s19, 0 }
 0x14a   : > { %3646 = vsyncadd (%p4447_p13), [#allocation18], 4294967280  ;;  %v512_v0 = vld [vmem:[#allocation3] sm:$0xff] (!%p4448_p11)  ;;  %v513_v1 = vld [vmem:[#allocation3 + $0x8] sm:$0xff] (!%p4448_p11) }
 0x14b   : > { %511 = sbr.rel (%p4448_p11) target bundleno = 338 (0x152), region = 104  ;;  %v514_v2 = vld [vmem:[#allocation3 + $0x10] sm:$0xff] (!%p4448_p11)  ;;  %516 = vst [vmem:[#allocation2] sm:$0xff] (!%p4448_p11), %v512_v0  ;;  %517 = vst [vmem:[#allocation2 + $0x8] sm:$0xff] (!%p4448_p11), %v513_v1  ;;  %v515_v3 = vld [vmem:[#allocation3 + $0x18] sm:$0xff] (!%p4448_p11) }
 0x14c   : > { %518 = vst [vmem:[#allocation2 + $0x10] sm:$0xff] (!%p4448_p11), %v514_v2  ;;  %519 = vst [vmem:[#allocation2 + $0x18] sm:$0xff] (!%p4448_p11), %v515_v3 }
 0x152 PF: > { %v3047_v4 = vld [vmem:[%s4063_s22 + $0x4] ss:$36 sps:$4 sm:$0xff]   ;;  %v3050_v6 = vld [vmem:[%s4063_s22 + $0x4c] ss:$36 sps:$4 sm:$0xff]   ;;  %v3053_v8 = vld [vmem:[%s4063_s22 + $0x94] ss:$36 sps:$4 sm:$0xff]  }
 0x153   : > { %v3049_v5 = vld [vmem:[%s4063_s22] ss:$36 sps:$4 sm:$0xff]   ;;  %1426 = vmatprep.subr.bf16.mxu0 %v3047_v4  ;;  %v3052_v7 = vld [vmem:[%s4063_s22 + $0x48] ss:$36 sps:$4 sm:$0xff]   ;;  %v3055_v9 = vld [vmem:[%s4063_s22 + $0x90] ss:$36 sps:$4 sm:$0xff]  }
 0x154   : > { %1427 = vmatpush1.bf16.msra.mxu0 %v3049_v5  ;;  %v3056_v10 = vld [vmem:[%s4063_s22 + $0xdc] ss:$36 sps:$4 sm:$0xff]   ;;  %v3059_v12 = vld [vmem:[%s4063_s22 + $0x124] ss:$36 sps:$4 sm:$0xff]   ;;  %v3062_v14 = vld [vmem:[%s4063_s22 + $0x16c] ss:$36 sps:$4 sm:$0xff]  }
 0x155   : > { %1428 = vmatprep.subr.bf16.mxu0 %v3050_v6  ;;  %v3058_v11 = vld [vmem:[%s4063_s22 + $0xd8] ss:$36 sps:$4 sm:$0xff]   ;;  %v3061_v13 = vld [vmem:[%s4063_s22 + $0x120] ss:$36 sps:$4 sm:$0xff]   ;;  %v3064_v15 = vld [vmem:[%s4063_s22 + $0x168] ss:$36 sps:$4 sm:$0xff]  }
 0x156   : > { %v3065_v16 = vld [vmem:[%s4063_s22 + $0x1b4] ss:$36 sps:$4 sm:$0xff]   ;;  %v525_v17 = vld [vmem:[#allocation2 + $0x8] sm:$0xff]  ;;  %v3074_v25 = vld [vmem:[%s4063_s22 + $0x28c] ss:$36 sps:$4 sm:$0xff]   ;;  %s3687_s12 = smov 124  }
 0x157   : > { %v527_v18 = vld [vmem:[#allocation2 + $0x18] sm:$0xff]  ;;  %v3068_v21 = vld [vmem:[%s4063_s22 + $0x1fc] ss:$36 sps:$4 sm:$0xff]   ;;  %v3071_v23 = vld [vmem:[%s4063_s22 + $0x244] ss:$36 sps:$4 sm:$0xff]   ;;  %vm1707_vm0 = vcmask 130048  }
 0x158   : > { %1429 = vmatpush1.bf16.msra.mxu0 %v3052_v7  ;;  %v4103_v19 = vpack.c.bf16 %v527_v18, %v525_v17  ;;  %v3067_v20 = vld [vmem:[%s4063_s22 + $0x1b0] ss:$36 sps:$4 sm:$0xff]   ;;  %v3070_v22 = vld [vmem:[%s4063_s22 + $0x1f8] ss:$36 sps:$4 sm:$0xff]   ;;  %v3073_v24 = vld [vmem:[%s4063_s22 + $0x240] ss:$36 sps:$4 sm:$0xff]  }
 0x159   : > { %1430 = vmatprep.subr.bf16.mxu0 %v3053_v8  ;;  %v3076_v26 = vld [vmem:[%s4063_s22 + $0x288] ss:$36 sps:$4 sm:$0xff]   ;;  %v3077_v27 = vld [vmem:[%s4063_s22 + $0x2d4] ss:$36 sps:$4 sm:$0xff]   ;;  %v3080_v29 = vld [vmem:[%s4063_s22 + $0x31c] ss:$36 sps:$4 sm:$0xff]  }
 0x15a   : > { %1458 = vmatprep.mubr.bf16.mxu0 %v4103_v19  ;;  %1501 = vmatprep.mubr.bf16.mxu1 %v4103_v19  ;;  %v3079_v28 = vld [vmem:[%s4063_s22 + $0x2d0] ss:$36 sps:$4 sm:$0xff]   ;;  %v3082_v30 = vld [vmem:[%s4063_s22 + $0x318] ss:$36 sps:$4 sm:$0xff]   ;;  %v3083_v31 = vld [vmem:[%s4063_s22 + $0x364] ss:$36 sps:$4 sm:$0xff]  }
 0x15b   : > { %v3085_v32 = vld [vmem:[%s4063_s22 + $0x360] ss:$36 sps:$4 sm:$0xff]   ;;  %v3086_v33 = vld [vmem:[%s4063_s22 + $0x3ac] ss:$36 sps:$4 sm:$0xff]   ;;  %v3089_v35 = vld [vmem:[%s4063_s22 + $0x3f4] ss:$36 sps:$4 sm:$0xff]  }
 0x15c   : > { %1431 = vmatpush1.bf16.msra.mxu0 %v3055_v9  ;;  %v3088_v34 = vld [vmem:[%s4063_s22 + $0x3a8] ss:$36 sps:$4 sm:$0xff]   ;;  %v3091_v36 = vld [vmem:[%s4063_s22 + $0x3f0] ss:$36 sps:$4 sm:$0xff]   ;;  %v3092_v37 = vld [vmem:[%s4063_s22 + $0x43c] ss:$36 sps:$4 sm:$0xff]  }
 0x15d   : > { %1432 = vmatprep.subr.bf16.mxu0 %v3056_v10  ;;  %v3094_v38 = vld [vmem:[%s4063_s22 + $0x438] ss:$36 sps:$4 sm:$0xff]   ;;  %v3156_v40 = vld [vmem:[%s4063_s22 + $0xc] ss:$36 sps:$4 sm:$0xff]   ;;  %v3168_v51 = vld [vmem:[%s4063_s22 + $0xe4] ss:$36 sps:$4 sm:$0xff]  }
 0x15e   : > { %v524_v39 = vld [vmem:[#allocation2] sm:$0xff]  ;;  %v526_v41 = vld [vmem:[#allocation2 + $0x10] sm:$0xff]  ;;  %1469 = vmatprep.subr.bf16.mxu1 %v3156_v40  ;;  %v3164_v46 = vld [vmem:[%s4063_s22 + $0x50] ss:$36 sps:$4 sm:$0xff]   ;;  %p2092_p0 = scmp.gt.s32.totalorder %s3767_s19, 0  ;;  %p2728_p2 = scmp.ne.s32.totalorder %s3767_s19, 2 }
 0x15f   : > { %v3159_v42 = vld [vmem:[%s4063_s22 + $0x8] ss:$36 sps:$4 sm:$0xff]   ;;  %v3097_v43 = vld [vmem:[%s4063_s22 + $0x14] ss:$36 sps:$4 sm:$0xff]   ;;  %v4130_v45 = vpack.c.bf16 %v526_v41, %v524_v39  ;;  %v3165_v48 = vld [vmem:[%s4063_s22 + $0x9c] ss:$36 sps:$4 sm:$0xff]  }
 0x160   : > { %1433 = vmatpush1.bf16.msra.mxu0 %v3058_v11  ;;  %1470 = vmatpush1.bf16.msra.mxu1 %v3159_v42  ;;  %v3161_v44 = vld [vmem:[%s4063_s22 + $0x54] ss:$36 sps:$4 sm:$0xff]   ;;  %v3100_v49 = vld [vmem:[%s4063_s22 + $0x5c] ss:$36 sps:$4 sm:$0xff]   ;;  %v3103_v53 = vld [vmem:[%s4063_s22 + $0xa4] ss:$36 sps:$4 sm:$0xff]  }
 0x161   : > { %1434 = vmatprep.subr.bf16.mxu0 %v3059_v12  ;;  %v3095_v47 = vld [vmem:[%s4063_s22 + $0x10] ss:$36 sps:$4 sm:$0xff]   ;;  %1471 = vmatprep.subr.bf16.mxu1 %v3161_v44  ;;  %v3167_v50 = vld [vmem:[%s4063_s22 + $0x98] ss:$36 sps:$4 sm:$0xff]   ;;  %v3170_v54 = vld [vmem:[%s4063_s22 + $0xe0] ss:$36 sps:$4 sm:$0xff]  }
 0x162   : > { %v3098_v52 = vld [vmem:[%s4063_s22 + $0x58] ss:$36 sps:$4 sm:$0xff]   ;;  %v3171_v55 = vld [vmem:[%s4063_s22 + $0x12c] ss:$36 sps:$4 sm:$0xff]   ;;  %v3101_v56 = vld [vmem:[%s4063_s22 + $0xa0] ss:$36 sps:$4 sm:$0xff]  }
 0x163   : > { %v3106_v57 = vld [vmem:[%s4063_s22 + $0xec] ss:$36 sps:$4 sm:$0xff]   ;;  %v3174_v59 = vld [vmem:[%s4063_s22 + $0x174] ss:$36 sps:$4 sm:$0xff]   ;;  %v3177_v63 = vld [vmem:[%s4063_s22 + $0x1bc] ss:$36 sps:$4 sm:$0xff]  }
 0x164   : > { %1435 = vmatpush1.bf16.msra.mxu0 %v3061_v13  ;;  %1472 = vmatpush1.bf16.msra.mxu1 %v3164_v46  ;;  %v3173_v58 = vld [vmem:[%s4063_s22 + $0x128] ss:$36 sps:$4 sm:$0xff]   ;;  %v3109_v61 = vld [vmem:[%s4063_s22 + $0x134] ss:$36 sps:$4 sm:$0xff]   ;;  %v3112_v1 = vld [vmem:[%s4063_s22 + $0x17c] ss:$36 sps:$4 sm:$0xff]  }
 0x165   : > { %1436 = vmatprep.subr.bf16.mxu0 %v3062_v14  ;;  %1473 = vmatprep.subr.bf16.mxu1 %v3165_v48  ;;  %v3104_v60 = vld [vmem:[%s4063_s22 + $0xe8] ss:$36 sps:$4 sm:$0xff]   ;;  %v3176_v62 = vld [vmem:[%s4063_s22 + $0x170] ss:$36 sps:$4 sm:$0xff]   ;;  %v3179_v2 = vld [vmem:[%s4063_s22 + $0x1b8] ss:$36 sps:$4 sm:$0xff]  }
 0x166   : > { %v3107_v0 = vld [vmem:[%s4063_s22 + $0x130] ss:$36 sps:$4 sm:$0xff]   ;;  %v3180_v3 = vld [vmem:[%s4063_s22 + $0x204] ss:$36 sps:$4 sm:$0xff]   ;;  %v3110_v4 = vld [vmem:[%s4063_s22 + $0x178] ss:$36 sps:$4 sm:$0xff]  }
 0x167   : > { %v3115_v5 = vld [vmem:[%s4063_s22 + $0x1c4] ss:$36 sps:$4 sm:$0xff]   ;;  %v3183_v7 = vld [vmem:[%s4063_s22 + $0x24c] ss:$36 sps:$4 sm:$0xff]   ;;  %v3186_v11 = vld [vmem:[%s4063_s22 + $0x294] ss:$36 sps:$4 sm:$0xff]  }
 0x168   : > { %1437 = vmatpush1.bf16.msra.mxu0 %v3064_v15  ;;  %1474 = vmatpush1.bf16.msra.mxu1 %v3167_v50  ;;  %v3182_v6 = vld [vmem:[%s4063_s22 + $0x200] ss:$36 sps:$4 sm:$0xff]   ;;  %v3118_v9 = vld [vmem:[%s4063_s22 + $0x20c] ss:$36 sps:$4 sm:$0xff]   ;;  %v3121_v13 = vld [vmem:[%s4063_s22 + $0x254] ss:$36 sps:$4 sm:$0xff]  }
 0x169   : > { %1438 = vmatprep.subr.bf16.mxu0 %v3065_v16  ;;  %1475 = vmatprep.subr.bf16.mxu1 %v3168_v51  ;;  %v3113_v8 = vld [vmem:[%s4063_s22 + $0x1c0] ss:$36 sps:$4 sm:$0xff]   ;;  %v3185_v10 = vld [vmem:[%s4063_s22 + $0x248] ss:$36 sps:$4 sm:$0xff]   ;;  %v3188_v14 = vld [vmem:[%s4063_s22 + $0x290] ss:$36 sps:$4 sm:$0xff]  }
 0x16a   : > { %v3116_v12 = vld [vmem:[%s4063_s22 + $0x208] ss:$36 sps:$4 sm:$0xff]   ;;  %v3189_v15 = vld [vmem:[%s4063_s22 + $0x2dc] ss:$36 sps:$4 sm:$0xff]   ;;  %v3119_v16 = vld [vmem:[%s4063_s22 + $0x250] ss:$36 sps:$4 sm:$0xff]  }
 0x16b   : > { %v3124_v17 = vld [vmem:[%s4063_s22 + $0x29c] ss:$36 sps:$4 sm:$0xff]   ;;  %v3142_v42 = vld [vmem:[%s4063_s22 + $0x44c] ss:$36 sps:$4 sm:$0xff]   ;;  %v3212_v44 = vld [vmem:[%s4063_s22 + $0x64] ss:$36 sps:$4 sm:$0xff]  }
 0x16c   : > { %1439 = vmatpush1.bf16.msra.mxu0 %v3067_v20  ;;  %1476 = vmatpush1.bf16.msra.mxu1 %v3170_v54  ;;  %v3191_v18 = vld [vmem:[%s4063_s22 + $0x2d8] ss:$36 sps:$4 sm:$0xff]   ;;  %v3192_v20 = vld [vmem:[%s4063_s22 + $0x324] ss:$36 sps:$4 sm:$0xff]   ;;  %s2093_s11 = scalar_select %p2092_p0, 1, 0 }
 0x16d   : > { %1440 = vmatprep.subr.bf16.mxu0 %v3068_v21  ;;  %1477 = vmatprep.subr.bf16.mxu1 %v3171_v55  ;;  %v3122_v21 = vld [vmem:[%s4063_s22 + $0x298] ss:$36 sps:$4 sm:$0xff]   ;;  %v3206_v39 = vld [vmem:[%s4063_s22 + $0x440] ss:$36 sps:$4 sm:$0xff]   ;;  %v3140_v46 = vld [vmem:[%s4063_s22 + $0x448] ss:$36 sps:$4 sm:$0xff]  }
 0x16e   : > { %v3209_v40 = vld [vmem:[%s4063_s22 + $0x1c] ss:$36 sps:$4 sm:$0xff]   ;;  %v3145_v51 = vld [vmem:[%s4063_s22 + $0x2a8] ss:$36 sps:$4 sm:$0xff]   ;;  %v3147_v55 = vld [vmem:[%s4063_s22 + $0x2f0] ss:$36 sps:$4 sm:$0xff]  }
 0x16f   : > { %v3137_v41 = vld [vmem:[%s4063_s22 + $0x400] ss:$36 sps:$4 sm:$0xff]   ;;  %v3146_v54 = vld [vmem:[%s4063_s22 + $0x68] ss:$36 sps:$4 sm:$0xff]   ;;  %vm2381_vm2 = vcmask (!%p2728_p2), 253952  }
 0x170   : > { %1441 = vmatpush1.bf16.msra.mxu0 %v3070_v22  ;;  %1478 = vmatpush1.bf16.msra.mxu1 %v3173_v58  ;;  %v3127_v22 = vld [vmem:[%s4063_s22 + $0x2e4] ss:$36 sps:$4 sm:$0xff]   ;;  %v3148_v58 = vld [vmem:[%s4063_s22 + $0xb0] ss:$36 sps:$4 sm:$0xff]  }
 0x171   : > { %1442 = vmatprep.subr.bf16.mxu0 %v3071_v23  ;;  %1479 = vmatprep.subr.bf16.mxu1 %v3174_v59  ;;  %v3194_v23 = vld [vmem:[%s4063_s22 + $0x320] ss:$36 sps:$4 sm:$0xff]   ;;  %v3149_v59 = vld [vmem:[%s4063_s22 + $0x338] ss:$36 sps:$4 sm:$0xff]  }
 0x172   : > { %v3210_v48 = vld [vmem:[%s4063_s22 + $0x60] ss:$36 sps:$4 sm:$0xff]  }
 0x173   : > { %v3144_v50 = vld [vmem:[%s4063_s22 + $0x20] ss:$36 sps:$4 sm:$0xff]  }
 0x174   : > { %1443 = vmatpush1.bf16.msra.mxu0 %v3073_v24  ;;  %1480 = vmatpush1.bf16.msra.mxu1 %v3176_v62  ;;  %v3195_v24 = vld [vmem:[%s4063_s22 + $0x36c] ss:$36 sps:$4 sm:$0xff]   ;;  %v3151_v62 = vld [vmem:[%s4063_s22 + $0x380] ss:$36 sps:$4 sm:$0xff]  }
 0x175   : > { %1444 = vmatprep.subr.bf16.mxu0 %v3074_v25  ;;  %1481 = vmatprep.subr.bf16.mxu1 %v3177_v63  ;;  %v3125_v25 = vld [vmem:[%s4063_s22 + $0x2e0] ss:$36 sps:$4 sm:$0xff]  }
 0x176   : > { %v3222_v63 = vld [vmem:[%s4063_s22 + $0x180] ss:$36 sps:$4 sm:$0xff]  }
 0x178   : > { %1445 = vmatpush1.bf16.msra.mxu0 %v3076_v26  ;;  %1482 = vmatpush1.bf16.msra.mxu1 %v3179_v2  ;;  %v3130_v26 = vld [vmem:[%s4063_s22 + $0x32c] ss:$36 sps:$4 sm:$0xff]  }
 0x179   : > { %1446 = vmatprep.subr.bf16.mxu0 %v3077_v27  ;;  %1483 = vmatprep.subr.bf16.mxu1 %v3180_v3  ;;  %v3197_v27 = vld [vmem:[%s4063_s22 + $0x368] ss:$36 sps:$4 sm:$0xff]  }
 0x17a   : > { %v3153_v2 = vld [vmem:[%s4063_s22 + $0x3c8] ss:$36 sps:$4 sm:$0xff]  }
 0x17b   : > { %v3225_v3 = vld [vmem:[%s4063_s22 + $0x1c8] ss:$36 sps:$4 sm:$0xff]  }
 0x17c   : > { %1447 = vmatpush1.bf16.msra.mxu0 %v3079_v28  ;;  %1484 = vmatpush1.bf16.msra.mxu1 %v3182_v6  ;;  %v3198_v28 = vld [vmem:[%s4063_s22 + $0x3b4] ss:$36 sps:$4 sm:$0xff]  }
 0x17d   : > { %1448 = vmatprep.subr.bf16.mxu0 %v3080_v29  ;;  %1485 = vmatprep.subr.bf16.mxu1 %v3183_v7  ;;  %v3128_v29 = vld [vmem:[%s4063_s22 + $0x328] ss:$36 sps:$4 sm:$0xff]   ;;  %v3155_v6 = vld [vmem:[%s4063_s22 + $0x410] ss:$36 sps:$4 sm:$0xff]  }
 0x17e   : > { %v3228_v7 = vld [vmem:[%s4063_s22 + $0x210] ss:$36 sps:$4 sm:$0xff]  }
 0x180   : > { %1449 = vmatpush1.bf16.msra.mxu0 %v3082_v30  ;;  %1486 = vmatpush1.bf16.msra.mxu1 %v3185_v10  ;;  %v3133_v30 = vld [vmem:[%s4063_s22 + $0x374] ss:$36 sps:$4 sm:$0xff]  }
 0x181   : > { %1450 = vmatprep.subr.bf16.mxu0 %v3083_v31  ;;  %1487 = vmatprep.subr.bf16.mxu1 %v3186_v11  ;;  %v3200_v31 = vld [vmem:[%s4063_s22 + $0x3b0] ss:$36 sps:$4 sm:$0xff]   ;;  %v3160_v10 = vld [vmem:[%s4063_s22 + $0x458] ss:$36 sps:$4 sm:$0xff]  }
 0x182   : > { %v3231_v11 = vld [vmem:[%s4063_s22 + $0x258] ss:$36 sps:$4 sm:$0xff]  }
 0x184   : > { %1451 = vmatpush1.bf16.msra.mxu0 %v3085_v32  ;;  %1488 = vmatpush1.bf16.msra.mxu1 %v3188_v14  ;;  %v3201_v32 = vld [vmem:[%s4063_s22 + $0x3fc] ss:$36 sps:$4 sm:$0xff]  }
 0x185   : > { %1452 = vmatprep.subr.bf16.mxu0 %v3086_v33  ;;  %1489 = vmatprep.subr.bf16.mxu1 %v3189_v15  ;;  %v3131_v33 = vld [vmem:[%s4063_s22 + $0x370] ss:$36 sps:$4 sm:$0xff]   ;;  %v3234_v14 = vld [vmem:[%s4063_s22 + $0x2a0] ss:$36 sps:$4 sm:$0xff]  }
 0x186   : > { %v3239_v15 = vld [vmem:[%s4063_s22 + $0x2ec] ss:$36 sps:$4 sm:$0xff]  }
 0x188   : > { %1453 = vmatpush1.bf16.msra.mxu0 %v3088_v34  ;;  %1490 = vmatpush1.bf16.msra.mxu1 %v3191_v18  ;;  %v3136_v34 = vld [vmem:[%s4063_s22 + $0x3bc] ss:$36 sps:$4 sm:$0xff]   ;;  %v3240_v18 = vld [vmem:[%s4063_s22 + $0x330] ss:$36 sps:$4 sm:$0xff]  }
 0x189   : > { %1454 = vmatprep.subr.bf16.mxu0 %v3089_v35  ;;  %1491 = vmatprep.subr.bf16.mxu1 %v3192_v20  ;;  %v3203_v35 = vld [vmem:[%s4063_s22 + $0x3f8] ss:$36 sps:$4 sm:$0xff]  }
 0x18a   : > { %v3245_v20 = vld [vmem:[%s4063_s22 + $0x37c] ss:$36 sps:$4 sm:$0xff]  }
 0x18c   : > { %1455 = vmatpush1.bf16.msra.mxu0 %v3091_v36  ;;  %1492 = vmatpush1.bf16.msra.mxu1 %v3194_v23  ;;  %v3204_v36 = vld [vmem:[%s4063_s22 + $0x444] ss:$36 sps:$4 sm:$0xff]  }
 0x18d   : > { %1456 = vmatprep.subr.bf16.mxu0 %v3092_v37  ;;  %1493 = vmatprep.subr.bf16.mxu1 %v3195_v24  ;;  %v3134_v37 = vld [vmem:[%s4063_s22 + $0x3b8] ss:$36 sps:$4 sm:$0xff]   ;;  %v3246_v23 = vld [vmem:[%s4063_s22 + $0x3c0] ss:$36 sps:$4 sm:$0xff]   ;;  %v3251_v24 = vld [vmem:[%s4063_s22 + $0x40c] ss:$36 sps:$4 sm:$0xff]  }
 0x190   : > { %1457 = vmatpush1.bf16.msra.mxu0 %v3094_v38  ;;  %1494 = vmatpush1.bf16.msra.mxu1 %v3197_v27  ;;  %v3139_v38 = vld [vmem:[%s4063_s22 + $0x404] ss:$36 sps:$4 sm:$0xff]   ;;  %v3252_v27 = vld [vmem:[%s4063_s22 + $0x450] ss:$36 sps:$4 sm:$0xff]  }
 0x191   : > { %1512 = vmatprep.subr.bf16.mxu0 %v3097_v43  ;;  %1495 = vmatprep.subr.bf16.mxu1 %v3198_v28  ;;  %v3207_v43 = vld [vmem:[%s4063_s22 + $0x18] ss:$36 sps:$4 sm:$0xff]   ;;  %v3685_v28 = vmov 0  }
 0x192   : > { %3040 = vset.pattern.permute.xlu1 %v3685_v28 }
 0x193   : > { %1459 = vmatmul.mubr.bf16.vlgmr.msra.gmra.mrb[0].mxu0 %v4130_v45 }
 0x194   : > { %1513 = vmatpush1.bf16.msra.mxu0 %v3095_v47  ;;  %1544 = vmatprep.mubr.bf16.mxu0 %v4103_v19  ;;  %v3143_v47 = vld [vmem:[%s4063_s22 + $0x260] ss:$36 sps:$4 sm:$0xff]  }
 0x195   : > { %1514 = vmatprep.subr.bf16.mxu0 %v3100_v49  ;;  %1496 = vmatpush1.bf16.msra.mxu1 %v3200_v31  ;;  %v3215_v49 = vld [vmem:[%s4063_s22 + $0xac] ss:$36 sps:$4 sm:$0xff]  }
 0x196   : > { %1497 = vmatprep.subr.bf16.mxu1 %v3201_v32 }
 0x198   : > { %1515 = vmatpush1.bf16.msra.mxu0 %v3098_v52  ;;  %v3213_v52 = vld [vmem:[%s4063_s22 + $0xa8] ss:$36 sps:$4 sm:$0xff]  }
 0x199   : > { %1516 = vmatprep.subr.bf16.mxu0 %v3103_v53  ;;  %1498 = vmatpush1.bf16.msra.mxu1 %v3203_v35  ;;  %v3218_v53 = vld [vmem:[%s4063_s22 + $0xf4] ss:$36 sps:$4 sm:$0xff]  }
 0x19a   : > { %1499 = vmatprep.subr.bf16.mxu1 %v3204_v36 }
 0x19c   : > { %1517 = vmatpush1.bf16.msra.mxu0 %v3101_v56  ;;  %v3216_v56 = vld [vmem:[%s4063_s22 + $0xf0] ss:$36 sps:$4 sm:$0xff]  }
 0x19d   : > { %1518 = vmatprep.subr.bf16.mxu0 %v3106_v57  ;;  %1500 = vmatpush1.bf16.msra.mxu1 %v3206_v39  ;;  %v3221_v57 = vld [vmem:[%s4063_s22 + $0x13c] ss:$36 sps:$4 sm:$0xff]  }
 0x19e   : > { %1555 = vmatprep.subr.bf16.mxu1 %v3209_v40 }
 0x1a0   : > { %1519 = vmatpush1.bf16.msra.mxu0 %v3104_v60  ;;  %1502 = vmatmul.mubr.bf16.vlgmr.msra.gmra.mrb[0].mxu1 %v4130_v45  ;;  %v3219_v60 = vld [vmem:[%s4063_s22 + $0x138] ss:$36 sps:$4 sm:$0xff]  }
 0x1a1   : > { %1520 = vmatprep.subr.bf16.mxu0 %v3109_v61  ;;  %1556 = vmatpush1.bf16.msra.mxu1 %v3207_v43  ;;  %v3150_v61 = vld [vmem:[%s4063_s22 + $0xf8] ss:$36 sps:$4 sm:$0xff]  }
 0x1a2   : > { %1587 = vmatprep.mubr.bf16.mxu1 %v4103_v19  ;;  %1557 = vmatprep.subr.bf16.mxu1 %v3212_v44 }
 0x1a4   : > { %1521 = vmatpush1.bf16.msra.mxu0 %v3107_v0  ;;  %v3227_v0 = vld [vmem:[%s4063_s22 + $0x1cc] ss:$36 sps:$4 sm:$0xff]  }
 0x1a5   : > { %1522 = vmatprep.subr.bf16.mxu0 %v3112_v1  ;;  %1558 = vmatpush1.bf16.msra.mxu1 %v3210_v48  ;;  %v3152_v1 = vld [vmem:[%s4063_s22 + $0x140] ss:$36 sps:$4 sm:$0xff]   ;;  %v3688_v48 = vmov 2  }
 0x1a6   : > { %1559 = vmatprep.subr.bf16.mxu1 %v3215_v49  ;;  %v3689_v49 = vmov 3  }
 0x1a8   : > { %1523 = vmatpush1.bf16.msra.mxu0 %v3110_v4  ;;  %v3230_v4 = vld [vmem:[%s4063_s22 + $0x214] ss:$36 sps:$4 sm:$0xff]  }
 0x1a9   : > { %1524 = vmatprep.subr.bf16.mxu0 %v3115_v5  ;;  %1560 = vmatpush1.bf16.msra.mxu1 %v3213_v52  ;;  %v3154_v5 = vld [vmem:[%s4063_s22 + $0x188] ss:$36 sps:$4 sm:$0xff]  }
 0x1aa   : > { %1561 = vmatprep.subr.bf16.mxu1 %v3218_v53 }
 0x1ac   : > { %1525 = vmatpush1.bf16.msra.mxu0 %v3113_v8  ;;  %v3233_v8 = vld [vmem:[%s4063_s22 + $0x25c] ss:$36 sps:$4 sm:$0xff]  }
 0x1ad   : > { %1526 = vmatprep.subr.bf16.mxu0 %v3118_v9  ;;  %1562 = vmatpush1.bf16.msra.mxu1 %v3216_v56  ;;  %v3158_v9 = vld [vmem:[%s4063_s22 + $0x1d0] ss:$36 sps:$4 sm:$0xff]  }
 0x1ae   : > { %1563 = vmatprep.subr.bf16.mxu1 %v3221_v57 }
 0x1b0   : > { %1527 = vmatpush1.bf16.msra.mxu0 %v3116_v12  ;;  %v3236_v12 = vld [vmem:[%s4063_s22 + $0x2a4] ss:$36 sps:$4 sm:$0xff]  }
 0x1b1   : > { %1528 = vmatprep.subr.bf16.mxu0 %v3121_v13  ;;  %1564 = vmatpush1.bf16.msra.mxu1 %v3219_v60  ;;  %v3163_v13 = vld [vmem:[%s4063_s22 + $0x218] ss:$36 sps:$4 sm:$0xff]  }
 0x1b4   : > { %1529 = vmatpush1.bf16.msra.mxu0 %v3119_v16  ;;  %v3237_v16 = vld [vmem:[%s4063_s22 + $0x2e8] ss:$36 sps:$4 sm:$0xff]  }
 0x1b5   : > { %1530 = vmatprep.subr.bf16.mxu0 %v3124_v17  ;;  %v3242_v17 = vld [vmem:[%s4063_s22 + $0x334] ss:$36 sps:$4 sm:$0xff]  }
 0x1b8   : > { %1531 = vmatpush1.bf16.msra.mxu0 %v3122_v21  ;;  %v3243_v21 = vld [vmem:[%s4063_s22 + $0x378] ss:$36 sps:$4 sm:$0xff]  }
 0x1b9   : > { %1532 = vmatprep.subr.bf16.mxu0 %v3127_v22  ;;  %v3248_v22 = vld [vmem:[%s4063_s22 + $0x3c4] ss:$36 sps:$4 sm:$0xff]  }
 0x1bc   : > { %1533 = vmatpush1.bf16.msra.mxu0 %v3125_v25  ;;  %v3249_v25 = vld [vmem:[%s4063_s22 + $0x408] ss:$36 sps:$4 sm:$0xff]  }
 0x1bd   : > { %1534 = vmatprep.subr.bf16.mxu0 %v3130_v26  ;;  %v3254_v26 = vld [vmem:[%s4063_s22 + $0x454] ss:$36 sps:$4 sm:$0xff]  }
 0x1c0   : > { %1535 = vmatpush1.bf16.msra.mxu0 %v3128_v29  ;;  %v3686_v29 = vmov 1  }
 0x1c1   : > { %1536 = vmatprep.subr.bf16.mxu0 %v3133_v30  ;;  %3041 = vset.pattern.permute.xlu0 %v3686_v29 }
 0x1c4   : > { %1537 = vmatpush1.bf16.msra.mxu0 %v3131_v33 }
 0x1c5   : > { %1538 = vmatprep.subr.bf16.mxu0 %v3136_v34 }
 0x1c8   : > { %1539 = vmatpush1.bf16.msra.mxu0 %v3134_v37 }
 0x1c9   : > { %1540 = vmatprep.subr.bf16.mxu0 %v3139_v38 }
 0x1cc   : > { %1541 = vmatpush1.bf16.msra.mxu0 %v3137_v41 }
 0x1cd   : > { %1542 = vmatprep.subr.bf16.mxu0 %v3142_v42 }
 0x1d0   : > { %1543 = vmatpush1.bf16.msra.mxu0 %v3140_v46 }
 0x1d1   : > { %2738 = vmatprep.subr.bf16.mxu0 %v3143_v47 }
 0x1d3   : > { %1545 = vmatmul.mubr.bf16.vlgmr.msra.gmra.mrb[4].mxu0 %v4130_v45 }
 0x1d4   : > { %2739 = vmatpush3.bf16.msra.mxu0 %v3144_v50  ;;  %1630 = vmatprep.mubr.bf16.mxu0 %v4103_v19  ;;  %v3224_v19 = vld [vmem:[%s4063_s22 + $0x184] ss:$36 sps:$4 sm:$0xff]  }
 0x1d5   : > { %2740 = vmatprep.subr.bf16.mxu0 %v3145_v51  ;;  %1565 = vmatprep.subr.bf16.mxu1 %v3224_v19 }
 0x1d6   : > { %1566 = vmatpush1.bf16.msra.mxu1 %v3222_v63 }
 0x1d7   : > { %1567 = vmatprep.subr.bf16.mxu1 %v3227_v0 }
 0x1d8   : > { %2741 = vmatpush3.bf16.msra.mxu0 %v3146_v54 }
 0x1d9   : > { %2742 = vmatprep.subr.bf16.mxu0 %v3147_v55 }
 0x1da   : > { %1568 = vmatpush1.bf16.msra.mxu1 %v3225_v3 }
 0x1db   : > { %1569 = vmatprep.subr.bf16.mxu1 %v3230_v4 }
 0x1dc   : > { %2743 = vmatpush3.bf16.msra.mxu0 %v3148_v58 }
 0x1dd   : > { %2744 = vmatprep.subr.bf16.mxu0 %v3149_v59  ;;  %v1695_v59 = vlaneseq }
 0x1de   : > { %1570 = vmatpush1.bf16.msra.mxu1 %v3228_v7 }
 0x1df   : > { %1571 = vmatprep.subr.bf16.mxu1 %v3233_v8 }
 0x1e0   : > { %2745 = vmatpush3.bf16.msra.mxu0 %v3150_v61  ;;  %v1696_v61 = vshrl.u32 %v1695_v59, 7 }
 0x1e1   : > { %2746 = vmatprep.subr.bf16.mxu0 %v3151_v62 }
 0x1e2   : > { %1572 = vmatpush1.bf16.msra.mxu1 %v3231_v11  ;;  %v4268_v63 = vsub.s32 0, %v1696_v61  ;;  %v4270_v0 = vsub.s32 1, %v1696_v61 }
 0x1e3   : > { %1573 = vmatprep.subr.bf16.mxu1 %v3236_v12 }
 0x1e4   : > { %2747 = vmatpush3.bf16.msra.mxu0 %v3152_v1  ;;  %v1888_v1 = vsub.s32 2, %v1696_v61 }
 0x1e5   : > { %2748 = vmatprep.subr.bf16.mxu0 %v3153_v2 }
 0x1e6   : > { %1574 = vmatpush1.bf16.msra.mxu1 %v3234_v14 }
 0x1e7   : > { %1575 = vmatprep.subr.bf16.mxu1 %v3239_v15 }
 0x1e8   : > { %2749 = vmatpush3.bf16.msra.mxu0 %v3154_v5 }
 0x1e9   : > { %2750 = vmatprep.subr.bf16.mxu0 %v3155_v6  ;;  %v2735_v6 = vld [vmem:[#allocation6] sm:$0xff]  }
 0x1ea   : > { %1576 = vmatpush1.bf16.msra.mxu1 %v3237_v16  ;;  %v2737_v12 = vunpack.c.h.bf16 %v2735_v6  ;;  %v2736_v15 = vunpack.c.l.bf16 %v2735_v6 }
 0x1eb   : > { %1577 = vmatprep.subr.bf16.mxu1 %v3242_v17 }
 0x1ec   : > { %2751 = vmatpush3.bf16.msra.mxu0 %v3158_v9 }
 0x1ed   : > { %2752 = vmatprep.subr.bf16.mxu0 %v3160_v10 }
 0x1ee   : > { %1578 = vmatpush1.bf16.msra.mxu1 %v3240_v18  ;;  %v1983_v18 = vsub.s32 3, %v1696_v61 }
 0x1ef   : > { %1579 = vmatprep.subr.bf16.mxu1 %v3245_v20 }
 0x1f0   : > { %2753 = vmatpush3.bf16.msra.mxu0 %v3163_v13 }
 0x1f2   : > { %1580 = vmatpush1.bf16.msra.mxu1 %v3243_v21 }
 0x1f3   : > { %1631 = vmatmul.mubr.bf16.vlgmr.msra.gmra.mrb[8].mxu0 %v4130_v45  ;;  %1581 = vmatprep.subr.bf16.mxu1 %v3248_v22 }
 0x1f6   : > { %1582 = vmatpush1.bf16.msra.mxu1 %v3246_v23 }
 0x1f7   : > { %1583 = vmatprep.subr.bf16.mxu1 %v3251_v24 }
 0x1fa   : > { %1584 = vmatpush1.bf16.msra.mxu1 %v3249_v25 }
 0x1fb   : > { %1585 = vmatprep.subr.bf16.mxu1 %v3254_v26 }
 0x1fe   : > { %1586 = vmatpush1.bf16.msra.mxu1 %v3252_v27 }
 0x201   : > { %1588 = vmatmul.mubr.bf16.vlgmr.msra.gmra.mrb[4].mxu1 %v4130_v45 }
 0x202   : > { %1764 = vmatprep.mubr.bf16.mxu1 %v3685_v28 }
 0x266   : > { %v1460_v30 = vpop.f32.mrb[0].mxu0 }
 0x267   : > { %v1462_v31 = vpop.f32.mrb[1].mxu0 }
 0x268   : > { %v1464_v32 = vpop.f32.mrb[2].mxu0 }
 0x269   : > { %v1679_v33 = vpack.c.bf16 %v1464_v32, %v1460_v30  ;;  %v1466_v34 = vpop.f32.mrb[3].mxu0 }
 0x26a   : > { %v1680_v35 = vpack.c.bf16 %v1466_v34, %v1462_v31 }
 0x26c   : > { %1732 = vmatprep.subr.bf16.mxu1 %v1680_v35 }
 0x26d   : > { %1733 = vmatpush1.bf16.msra.mxu1 %v1679_v33 }
 0x273   : > { %v4262_v52 = vpop.f32.mrb[0].mxu1 }
 0x274   : > { %v1505_v53 = vpop.f32.mrb[1].mxu1 }
 0x275   : > { %v4264_v54 = vpop.f32.mrb[2].mxu1 }
 0x276   : > { %v1681_v55 = vpack.c.bf16 %v4264_v54, %v4262_v52  ;;  %v1509_v56 = vpop.f32.mrb[3].mxu1 }
 0x277   : > { %v1682_v57 = vpack.c.bf16 %v1509_v56, %v1505_v53 }
 0x279   : > { %1827 = vmatprep.subr.bf16.mxu1 %v1682_v57 }
 0x2a6   : > { %v4250_v36 = vpop.f32.mrb[4].mxu0 }
 0x2a7   : > { %v4252_v37 = vpop.f32.mrb[5].mxu0 }
 0x2a8   : > { %v4254_v45 = vpop.f32.mrb[6].mxu0 }
 0x2a9   : > { %v1683_v38 = vpack.c.bf16 %v4254_v45, %v4250_v36  ;;  %v4258_v39 = vpop.f32.mrb[7].mxu0 }
 0x2aa   : > { %v1684_v40 = vpack.c.bf16 %v4258_v39, %v4252_v37 }
 0x2c6   : > { %v2754_v41 = vpop.f32.mrb[8].mxu0 }
 0x2c7   : > { %v2755_v42 = vpop.f32.mrb[9].mxu0 }
 0x2c8   : > { %v2756_v43 = vadd.f32 %v2755_v42, %v2754_v41  ;;  %v2757_v44 = vpop.f32.mrb[10].mxu0 }
 0x2c9   : > { %v2758_v46 = vpop.f32.mrb[11].mxu0 }
 0x2ca   : > { %v2759_v47 = vadd.f32 %v2758_v46, %v2757_v44  ;;  %1688 = vperm.xlu1 %3040, %v2756_v43   ;;  %1641 = vrot.lane.b32.xlu0 %v2756_v43, %s3687_s12 }
 0x2ce   : > { %1692 = vperm.xlu1 %3040, %v2759_v47   ;;  %1643 = vrot.lane.b32.xlu0 %v2759_v47, %s3687_s12 }
 0x2d2   : > { %3042 = vset.pattern.permute.xlu1 %v3686_v29  ;;  %1784 = vperm.xlu0 %3041, %v2756_v43  }
 0x2d3   : > { %1788 = vperm.xlu1 %3042, %v2759_v47  }
 0x2d6   : > { %3045 = vset.pattern.permute.xlu0 %v3688_v48 }
 0x2d7   : > { %3043 = vset.pattern.permute.xlu1 %v3688_v48  ;;  %1883 = vperm.xlu0 %3045, %v2759_v47  }
 0x2d8   : > { %1879 = vperm.xlu1 %3043, %v2756_v43  }
 0x2dc   : > { %3044 = vset.pattern.permute.xlu1 %v3689_v49 }
 0x2dd   : > { %1974 = vperm.xlu1 %3044, %v2756_v43  }
 0x2e1   : > { %1978 = vperm.xlu1 %3044, %v2759_v47  }
 0x33c   : > { %v1642_v50 = vpop.permute.xlu0 %1641 }
 0x33d   : > { %1647 = vxpose.xlu0.b32.start [1/2] (short) (narrow) %v1642_v50, 8 }
 0x340   : > { %v1644_v51 = vpop.permute.xlu0 %1643 }
 0x341   : > { %1648 = vxpose.xlu0.b32.end [2/2] (short) (narrow) %v1644_v51, 8 }
 0x349   : > { %v1689_v58 = vpop.permute.xlu1 %1688 }
 0x34d   : > { %v1693_v19 = vpop.permute.xlu1 %1692 }
 0x351   : > { %v1785_v60 = vpop.permute.xlu0 %1784 }
 0x352   : > { %v1789_v2 = vpop.permute.xlu1 %1788 }
 0x356   : > { %v1884_v62 = vpop.permute.xlu0 %1883 }
 0x357   : > { %v1880_v13 = vpop.permute.xlu1 %1879 }
 0x35c   : > { %v1975_v31 = vpop.permute.xlu1 %1974 }
 0x360   : > { %v1979_v47 = vpop.permute.xlu1 %1978 }
 0x36a   : > { %3046 = vset.pattern.permute.xlu0 %v3689_v49 }
 0x3bd   : > { %v1663_v3 = vpop.trf.xlu0 }
 0x3be   : > { %v1698_v4 = vrot.slane %v1663_v3, %v4268_v63  ;;  %v1794_v5 = vrot.slane %v1663_v3, %v4270_v0  ;;  %v1889_v7 = vrot.slane %v1663_v3, %v1888_v1  ;;  %v1984_v27 = vrot.slane %v1663_v3, %v1983_v18  ;;  %v4282_v3 = vpop.f32.mrb[4].mxu1 }
 0x3c0   : > { %v1700_v8 = vadd.f32 %v1698_v4, %v1693_v19  ;;  %v1699_v9 = vadd.f32 %v1698_v4, %v1689_v58  ;;  %v1795_v10 = vadd.f32 %v1794_v5, %v1785_v60  ;;  %v1796_v11 = vadd.f32 %v1794_v5, %v1789_v2  ;;  %v1591_v4 = vpop.f32.mrb[5].mxu1 }
 0x3c1   : > { %v1890_v20 = vadd.f32 %v1889_v7, %v1880_v13  ;;  %v1891_v30 = vadd.f32 %v1889_v7, %v1884_v62  ;;  %v1985_v41 = vadd.f32 %v1984_v27, %v1975_v31  ;;  %v1986_v48 = vadd.f32 %v1984_v27, %v1979_v47  ;;  %v4284_v5 = vpop.f32.mrb[6].mxu1 }
 0x3c2   : > { %v1702_v14 = vmul.f32 0.2, %v1700_v8  ;;  %v1701_v16 = vmul.f32 0.2, %v1699_v9  ;;  %v1797_v17 = vmul.f32 0.2, %v1795_v10  ;;  %v1685_v6 = vpack.c.bf16 %v4284_v5, %v4282_v3 }
 0x3c3   : > { %v1798_v24 = vmul.f32 0.2, %v1796_v11  ;;  %v1892_v29 = vmul.f32 0.2, %v1890_v20  ;;  %v1893_v46 = vmul.f32 0.2, %v1891_v30 }
 0x3c4   : > { %v1704_v21 = vmax.f32 %v1700_v8, %v1702_v14  ;;  %v1703_v22 = vmax.f32 %v1699_v9, %v1701_v16  ;;  %v1799_v23 = vmax.f32 %v1795_v10, %v1797_v17  ;;  %v1987_v53 = vmul.f32 0.2, %v1985_v41  ;;  %v1595_v7 = vpop.f32.mrb[7].mxu1 }
 0x3c5   : > { %v1800_v35 = vmax.f32 %v1796_v11, %v1798_v24  ;;  %v1894_v44 = vmax.f32 %v1890_v20, %v1892_v29  ;;  %v1895_v51 = vmax.f32 %v1891_v30, %v1893_v46  ;;  %v1988_v59 = vmul.f32 0.2, %v1986_v48 }
 0x3c6   : > { %v1706_v25 = vadd.f32 %v2737_v12, %v1704_v21  ;;  %v1705_v26 = vadd.f32 %v2736_v15, %v1703_v22  ;;  %v1801_v34 = vadd.f32 %v2736_v15, %v1799_v23  ;;  %v1989_v58 = vmax.f32 %v1985_v41, %v1987_v53 }
 0x3c7   : > { %v1802_v43 = vadd.f32 %v2737_v12, %v1800_v35  ;;  %v1896_v50 = vadd.f32 %v2736_v15, %v1894_v44  ;;  %v1897_v57 = vadd.f32 %v2737_v12, %v1895_v51  ;;  %v1990_v61 = vmax.f32 %v1986_v48, %v1988_v59 }
 0x3c8   : > { %v1711_v32 = vsel %vm1707_vm0, %v1706_v25, -inf  ;;  %v1708_v33 = vsel %vm1707_vm0, %v1705_v26, -inf  ;;  %v1803_v42 = vsel %vm1707_vm0, %v1801_v34, -inf  ;;  %v1991_v19 = vadd.f32 %v2736_v15, %v1989_v58 }
 0x3c9   : > { %1712 = vmax.xlane.f32.xlu0 %v1711_v32  ;;  %1709 = vmax.xlane.f32.xlu1 %v1708_v33  ;;  %v1806_v49 = vsel %vm1707_vm0, %v1802_v43, -inf  ;;  %v1898_v56 = vsel %vm1707_vm0, %v1896_v50, -inf  ;;  %v1901_v60 = vsel %vm1707_vm0, %v1897_v57, -inf  ;;  %v1992_v1 = vadd.f32 %v2737_v12, %v1990_v61 }
 0x3ca   : > { %v1993_v62 = vsel %vm1707_vm0, %v1991_v19, -inf  ;;  %v1686_v8 = vpack.c.bf16 %v1595_v7, %v1591_v4 }
 0x3cb   : > { %v1996_v2 = vsel %vm1707_vm0, %v1992_v1, -inf }
 0x3cd   : > { %1804 = vmax.xlane.f32.xlu1 %v1803_v42 }
 0x3d1   : > { %1807 = vmax.xlane.f32.xlu1 %v1806_v49 }
 0x3d5   : > { %1899 = vmax.xlane.f32.xlu1 %v1898_v56 }
 0x3d9   : > { %1902 = vmax.xlane.f32.xlu1 %v1901_v60 }
 0x3dd   : > { %1994 = vmax.xlane.f32.xlu1 %v1993_v62 }
 0x3e1   : > { %1997 = vmax.xlane.f32.xlu1 %v1996_v2 }
 0x456   : > { %v1713_v9 = vpop.xlane.xlu0 %1712  ;;  %v1710_v10 = vpop.xlane.xlu1 %1709 }
 0x457   : > { %v1715_v11 = vsub.f32 %v1706_v25, %v1713_v9  ;;  %v1714_v13 = vsub.f32 %v1705_v26, %v1710_v10 }
 0x459   : > { %v1718_v14 = vmul.f32 1.442695, %v1715_v11  ;;  %v1716_v12 = vmul.f32 1.442695, %v1714_v13 }
 0x45a   : > { %v1805_v15 = vpop.xlane.xlu1 %1804 }
 0x45b   : > { %3255 = vpow2.f32 %v1718_v14  ;;  %v1809_v16 = vsub.f32 %v1801_v34, %v1805_v15 }
 0x45c   : > { %3257 = vpow2.f32 %v1716_v12 }
 0x45d   : > { %v1811_v17 = vmul.f32 1.442695, %v1809_v16 }
 0x45e   : > { %v1808_v18 = vpop.xlane.xlu1 %1807 }
 0x45f   : > { %v1810_v20 = vsub.f32 %v1802_v43, %v1808_v18  ;;  %3259 = vpow2.f32 %v1811_v17 }
 0x461   : > { %v1813_v21 = vmul.f32 1.442695, %v1810_v20 }
 0x462   : > { %v1900_v22 = vpop.xlane.xlu1 %1899 }
 0x463   : > { %3261 = vpow2.f32 %v1813_v21  ;;  %v1904_v23 = vsub.f32 %v1896_v50, %v1900_v22 }
 0x465   : > { %v3256_v24 = vpop.eup %3255  ;;  %v1906_v29 = vmul.f32 1.442695, %v1904_v23 }
 0x466   : > { %v3258_v27 = vpop.eup %3257  ;;  %v1903_v30 = vpop.xlane.xlu1 %1902  ;;  %v1723_v35 = vsel %vm1707_vm0, %v3256_v24, 0.0 }
 0x467   : > { %v1905_v25 = vsub.f32 %v1897_v57, %v1903_v30  ;;  %v1720_v26 = vsel %vm1707_vm0, %v3258_v27, 0.0  ;;  %v1728_v31 = vpack.c.bf16 %v3256_v24, %v3258_v27  ;;  %3263 = vpow2.f32 %v1906_v29 }
 0x468   : > { %1721 = vadd.xlane.f32.xlu1 %v1720_v26 }
 0x469   : > { %v1908_v32 = vmul.f32 1.442695, %v1905_v25  ;;  %2724 = vmatmul.mubr.msk.bf16.vlgmr.msra.gmra.mrb[8].mxu1 %vm1707_vm0, %v1728_v31  ;;  %v3260_v41 = vpop.eup %3259 }
 0x46a   : > { %1828 = vmatpush1.bf16.msra.mxu1 %v1681_v55  ;;  %v1995_v33 = vpop.xlane.xlu1 %1994  ;;  %1859 = vmatprep.mubr.bf16.mxu1 %v3685_v28  ;;  %v1815_v54 = vsel %vm1707_vm0, %v3260_v41, 0.0 }
 0x46b   : > { %3265 = vpow2.f32 %v1908_v32  ;;  %1922 = vmatprep.subr.bf16.mxu1 %v1684_v40  ;;  %v1999_v34 = vsub.f32 %v1991_v19, %v1995_v33 }
 0x46c   : > { %1724 = vadd.xlane.f32.xlu1 %v1723_v35 }
 0x46d   : > { %v3262_v42 = vpop.eup %3261  ;;  %v2001_v43 = vmul.f32 1.442695, %v1999_v34 }
 0x46e   : > { %v1998_v44 = vpop.xlane.xlu1 %1997  ;;  %v1823_v46 = vpack.c.bf16 %v3262_v42, %v3260_v41  ;;  %v1818_v37 = vsel %vm1707_vm0, %v3262_v42, 0.0 }
 0x46f   : > { %3267 = vpow2.f32 %v2001_v43  ;;  %v2000_v52 = vsub.f32 %v1992_v1, %v1998_v44 }
 0x470   : > { %1816 = vadd.xlane.f32.xlu1 %v1815_v54 }
 0x471   : > { %v2003_v55 = vmul.f32 1.442695, %v2000_v52  ;;  %2725 = vmatmul.mubr.msk.bf16.vlgmr.msra.gmra.mrb[12].mxu1 %vm1707_vm0, %v1823_v46  ;;  %v3264_v39 = vpop.eup %3263  ;;  %v2072_v52 = vld [vmem:[%s446_s4] sm:$0x3] }
 0x472   : > { %1923 = vmatpush1.bf16.msra.mxu1 %v1683_v38  ;;  %1954 = vmatprep.mubr.bf16.mxu1 %v3685_v28  ;;  %v1910_v49 = vsel %vm1707_vm0, %v3264_v39, 0.0 }
 0x473   : > { %3269 = vpow2.f32 %v2003_v55  ;;  %2017 = vmatprep.subr.bf16.mxu1 %v1686_v8 }
 0x474   : > { %1819 = vadd.xlane.f32.xlu1 %v1818_v37 }
 0x475   : > { %v3266_v40 = vpop.eup %3265 }
 0x476   : > { %v1913_v47 = vsel %vm1707_vm0, %v3266_v40, 0.0  ;;  %v1918_v48 = vpack.c.bf16 %v3266_v40, %v3264_v39  ;;  %v2094_v39 = vstv %s2093_s11 }
 0x477   : > { %1914 = vadd.xlane.f32.xlu0 %v1913_v47  ;;  %vm4320_vm1 = vcmp.eq.s32.totalorder %v2094_v39, 1 }
 0x478   : > { %1911 = vadd.xlane.f32.xlu1 %v1910_v49  ;;  %v2077_v49 = vrot.slane %v2072_v52, %v4268_v63 }
 0x479   : > { %v3268_v50 = vpop.eup %3267  ;;  %2726 = vmatmul.mubr.msk.bf16.vlgmr.msra.gmra.mrb[16].mxu1 %vm1707_vm0, %v1918_v48 }
 0x47a   : > { %2018 = vmatpush1.bf16.msra.mxu1 %v1685_v6  ;;  %v2005_v36 = vsel %vm1707_vm0, %v3268_v50, 0.0  ;;  %2049 = vmatprep.mubr.bf16.mxu1 %v3685_v28 }
 0x47c   : > { %2006 = vadd.xlane.f32.xlu1 %v2005_v36 }
 0x47d   : > { %v3270_v45 = vpop.eup %3269 }
 0x47e   : > { %v2008_v38 = vsel %vm1707_vm0, %v3270_v45, 0.0  ;;  %v2013_v51 = vpack.c.bf16 %v3270_v45, %v3268_v50 }
 0x47f   : > { %2009 = vadd.xlane.f32.xlu0 %v2008_v38  ;;  %v2081_v38 = vrot.slane %v2072_v52, %v4270_v0  ;;  %v2144_v52 = vld [vmem:[#allocation10 + $0x78] sm:$0xff] (!%p2728_p2) }
 0x481   : > { %2727 = vmatmul.mubr.msk.bf16.vlgmr.msra.gmra.mrb[20].mxu1 %vm1707_vm0, %v2013_v51 }
 0x4f5   : > { %v1722_v53 = vpop.xlane.xlu1 %1721 }
 0x4f6   : > { %3271 = vrcp.f32 %v1722_v53 }
 0x4f9   : > { %v1725_v56 = vpop.xlane.xlu1 %1724 }
 0x4fd   : > { %v1817_v57 = vpop.xlane.xlu1 %1816 }
 0x4fe   : > { %3273 = vrcp.f32 %v1817_v57 }
 0x4ff   : > { %3275 = vrcp.f32 %v1725_v56  ;;  %v2150_v56 = vld [vmem:[#allocation10 + $0xa8] sm:$0xff] (!%p2728_p2) }
 0x500   : > { %v3272_v1 = vpop.eup %3271 }
 0x501   : > { %v1820_v58 = vpop.xlane.xlu1 %1819 }
 0x502   : > { %3277 = vrcp.f32 %v1820_v58 }
 0x504   : > { %v1915_v62 = vpop.xlane.xlu0 %1914 }
 0x505   : > { %v1912_v28 = vpop.xlane.xlu1 %1911 }
 0x506   : > { %3279 = vrcp.f32 %v1912_v28  ;;  %v3287_v28 = vld [vmem:[#allocation2] sm:$0xff] }
 0x507   : > { %3281 = vrcp.f32 %v1915_v62 }
 0x508   : > { %v3274_v2 = vpop.eup %3273 }
 0x509   : > { %v3276_v4 = vpop.eup %3275  ;;  %v2007_v13 = vpop.xlane.xlu1 %2006 }
 0x50a   : > { %3283 = vrcp.f32 %v2007_v13  ;;  %v3290_v13 = vld [vmem:[#allocation2 + $0x18] sm:$0xff] }
 0x50c   : > { %v3278_v8 = vpop.eup %3277  ;;  %v2010_v21 = vpop.xlane.xlu0 %2009 }
 0x50d   : > { %3285 = vrcp.f32 %v2010_v21  ;;  %v2129_v21 = vld [vmem:[#allocation10] sm:$0xff] (!%p2728_p2) }
 0x510   : > { %v3280_v24 = vpop.eup %3279 }
 0x511   : > { %v3282_v25 = vpop.eup %3281 }
 0x514   : > { %v3284_v44 = vpop.eup %3283 }
 0x517   : > { %v3286_v37 = vpop.eup %3285 }
 0x53c   : > { %v1766_v59 = vpop.f32.mrb[8].mxu1 }
 0x53d   : > { %v1768_v60 = vpop.f32.mrb[9].mxu1  ;;  %v1775_v5 = vmul.f32 %v3272_v1, %v1766_v59 }
 0x53e   : > { %v1770_v19 = vpop.f32.mrb[10].mxu1  ;;  %v1776_v9 = vmul.f32 %v3272_v1, %v1768_v60 }
 0x53f   : > { %v1772_v61 = vpop.f32.mrb[11].mxu1  ;;  %v1777_v14 = vmul.f32 %v3276_v4, %v1770_v19 }
 0x540   : > { %v1778_v17 = vmul.f32 %v3276_v4, %v1772_v61  ;;  %v2096_v61 = vsel %vm4320_vm1, %v3287_v28, 0.0  ;;  %v2151_v28 = vld [vmem:[#allocation10 + $0xb0] sm:$0xff] (!%p2728_p2) }
 0x544   : > { %v1861_v3 = vpop.f32.mrb[12].mxu1 }
 0x545   : > { %v1870_v6 = vmul.f32 %v3274_v2, %v1861_v3  ;;  %v1863_v7 = vpop.f32.mrb[13].mxu1  ;;  %v3288_v3 = vld [vmem:[#allocation2 + $0x8] sm:$0xff] }
 0x546   : > { %v1871_v10 = vmul.f32 %v3274_v2, %v1863_v7  ;;  %v1865_v11 = vpop.f32.mrb[14].mxu1  ;;  %v2097_v4 = vsel %vm4320_vm1, %v3288_v3, 0.0  ;;  %v3289_v7 = vld [vmem:[#allocation2 + $0x10] sm:$0xff]  ;;  %v2155_v3 = vld [vmem:[#allocation10 + $0xd0] sm:$0xff] (!%p2728_p2) }
 0x547   : > { %v1874_v12 = vadd.f32 %v1870_v6, %v1775_v5  ;;  %v1872_v15 = vmul.f32 %v3278_v8, %v1865_v11  ;;  %v1867_v16 = vpop.f32.mrb[15].mxu1 }
 0x548   : > { %v1875_v18 = vadd.f32 %v1871_v10, %v1776_v9  ;;  %v1873_v20 = vmul.f32 %v3278_v8, %v1867_v16  ;;  %v2098_v8 = vsel %vm4320_vm1, %v3289_v7, 0.0  ;;  %v2294_v7 = vld [vmem:[#allocation13 + $0x80] sm:$0xff] (!%p2728_p2) }
 0x549   : > { %v1876_v22 = vadd.f32 %v1872_v15, %v1777_v14  ;;  %v2099_v14 = vsel %vm4320_vm1, %v3290_v13, 0.0  ;;  %v2279_v13 = vld [vmem:[#allocation13 + $0x8] sm:$0xff] (!%p2728_p2) }
 0x54a   : > { %v1877_v23 = vadd.f32 %v1873_v20, %v1778_v17  ;;  %v2132_v20 = vld [vmem:[#allocation10 + $0x18] sm:$0xff] (!%p2728_p2) }
 0x54c   : > { %v1956_v27 = vpop.f32.mrb[16].mxu1 }
 0x54d   : > { %v1965_v29 = vmul.f32 %v3280_v24, %v1956_v27  ;;  %v1958_v30 = vpop.f32.mrb[17].mxu1  ;;  %v2134_v27 = vld [vmem:[#allocation10 + $0x28] sm:$0xff] (!%p2728_p2) }
 0x54e   : > { %v1966_v26 = vmul.f32 %v3280_v24, %v1958_v30  ;;  %v1960_v31 = vpop.f32.mrb[18].mxu1  ;;  %v2131_v24 = vld [vmem:[#allocation10 + $0x10] sm:$0xff] (!%p2728_p2) }
 0x54f   : > { %v1969_v32 = vadd.f32 %v1965_v29, %v1874_v12  ;;  %v1967_v33 = vmul.f32 %v3282_v25, %v1960_v31  ;;  %v1962_v34 = vpop.f32.mrb[19].mxu1  ;;  %v2136_v29 = vld [vmem:[#allocation10 + $0x38] sm:$0xff] (!%p2728_p2)  ;;  %v2797_v30 = vpack.c.bf16 (!%p2728_p2), %v2131_v24, %v2129_v21  ;;  %v2135_v31 = vld [vmem:[#allocation10 + $0x30] sm:$0xff] (!%p2728_p2) }
 0x550   : > { %v1970_v35 = vadd.f32 %v1966_v26, %v1875_v18  ;;  %v1968_v41 = vmul.f32 %v3282_v25, %v1962_v34  ;;  %v2130_v18 = vld [vmem:[#allocation10 + $0x8] sm:$0xff] (!%p2728_p2)  ;;  %v2799_v25 = vpack.c.bf16 (!%p2728_p2), %v2136_v29, %v2134_v27  ;;  %v2133_v26 = vld [vmem:[#allocation10 + $0x20] sm:$0xff] (!%p2728_p2)  ;;  %v2140_v34 = vld [vmem:[#allocation10 + $0x58] sm:$0xff] (!%p2728_p2) }
 0x551   : > { %v1971_v42 = vadd.f32 %v1967_v33, %v1876_v22  ;;  %v2157_v27 = vld [vmem:[#allocation10 + $0xe0] sm:$0xff] (!%p2728_p2)  ;;  %v2159_v29 = vld [vmem:[#allocation10 + $0xf0] sm:$0xff] (!%p2728_p2) }
 0x552   : > { %v1972_v43 = vadd.f32 %v1968_v41, %v1877_v23  ;;  %v2795_v23 = vpack.c.bf16 (!%p2728_p2), %v2132_v20, %v2130_v18  ;;  %v2281_v18 = vld [vmem:[#allocation13 + $0x18] sm:$0xff] (!%p2728_p2) }
 0x554   : > { %v2051_v46 = vpop.f32.mrb[20].mxu1  ;;  %2796 = vmatprep.subr.bf16.mxu0 (!%p2728_p2), %v2795_v23  ;;  %v2299_v23 = vld [vmem:[#allocation13 + $0xa8] sm:$0xff] (!%p2728_p2) }
 0x555   : > { %v2060_v54 = vmul.f32 %v3284_v44, %v2051_v46  ;;  %v2053_v55 = vpop.f32.mrb[21].mxu1  ;;  %2798 = vmatpush1.bf16.msra.mxu0 (!%p2728_p2), %v2797_v30  ;;  %v2142_v46 = vld [vmem:[#allocation10 + $0x68] sm:$0xff] (!%p2728_p2) }
 0x556   : > { %v2061_v40 = vmul.f32 %v3284_v44, %v2053_v55  ;;  %v2055_v47 = vpop.f32.mrb[22].mxu1  ;;  %2800 = vmatprep.subr.bf16.mxu0 (!%p2728_p2), %v2799_v25  ;;  %v2139_v44 = vld [vmem:[#allocation10 + $0x50] sm:$0xff] (!%p2728_p2)  ;;  %v2807_v39 = vpack.c.bf16 (!%p2728_p2), %v2144_v52, %v2142_v46  ;;  %v2162_v30 = vld [vmem:[#allocation10 + $0x108] sm:$0xff] (!%p2728_p2) }
 0x557   : > { %v2064_v48 = vadd.f32 %v2060_v54, %v1969_v32  ;;  %v2062_v50 = vmul.f32 %v3286_v37, %v2055_v47  ;;  %v2057_v36 = vpop.f32.mrb[23].mxu1  ;;  %v2138_v32 = vld [vmem:[#allocation10 + $0x48] sm:$0xff] (!%p2728_p2)  ;;  %v2143_v47 = vld [vmem:[#allocation10 + $0x70] sm:$0xff] (!%p2728_p2) }
 0x558   : > { %v2065_v45 = vadd.f32 %v2061_v40, %v1970_v35  ;;  %v2063_v51 = vmul.f32 %v3286_v37, %v2057_v36  ;;  %v2801_v35 = vpack.c.bf16 (!%p2728_p2), %v2135_v31, %v2133_v26  ;;  %v2141_v40 = vld [vmem:[#allocation10 + $0x60] sm:$0xff] (!%p2728_p2)  ;;  %v2164_v26 = vld [vmem:[#allocation10 + $0x118] sm:$0xff] (!%p2728_p2)  ;;  %v2166_v46 = vld [vmem:[#allocation10 + $0x128] sm:$0xff] (!%p2728_p2) }
 0x559   : > { %v2068_v53 = vmul.f32 0.25, %v2064_v48  ;;  %v2066_v57 = vadd.f32 %v2062_v50, %v1971_v42  ;;  %v2803_v42 = vpack.c.bf16 (!%p2728_p2), %v2140_v34, %v2138_v32  ;;  %v2146_v48 = vld [vmem:[#allocation10 + $0x88] sm:$0xff] (!%p2728_p2)  ;;  %v2809_v36 = vpack.c.bf16 (!%p2728_p2), %v2143_v47, %v2141_v40  ;;  %v2300_v34 = vld [vmem:[#allocation13 + $0xb0] sm:$0xff] (!%p2728_p2) }
 0x55a   : > { %v2069_v58 = vmul.f32 0.25, %v2065_v45  ;;  %v2067_v59 = vadd.f32 %v2063_v51, %v1972_v43  ;;  %v2137_v43 = vld [vmem:[#allocation10 + $0x40] sm:$0xff] (!%p2728_p2)  ;;  %2802 = vmatpush1.bf16.msra.mxu0 (!%p2728_p2), %v2801_v35  ;;  %v2303_v47 = vld [vmem:[#allocation13 + $0xc8] sm:$0xff] (!%p2728_p2) }
 0x55b   : > { %v2084_v60 = vadd.f32 %v2077_v49, %v2068_v53  ;;  %v2070_v19 = vmul.f32 0.25, %v2066_v57  ;;  %v2805_v55 = vpack.c.bf16 (!%p2728_p2), %v2139_v44, %v2137_v43  ;;  %2804 = vmatprep.subr.bf16.mxu0 (!%p2728_p2), %v2803_v42  ;;  %v2145_v51 = vld [vmem:[#allocation10 + $0x80] sm:$0xff] (!%p2728_p2)  ;;  %v2147_v53 = vld [vmem:[#allocation10 + $0x90] sm:$0xff] (!%p2728_p2)  ;;  %v2152_v57 = vld [vmem:[#allocation10 + $0xb8] sm:$0xff] (!%p2728_p2)  ;;  %v2827_v42 = vpack.c.bf16 (!%p2728_p2), %v2164_v26, %v2162_v30 }
 0x55c   : > { %v2085_v62 = vadd.f32 %v2081_v38, %v2069_v58  ;;  %v2071_v1 = vmul.f32 0.25, %v2067_v59  ;;  %v2813_v59 = vpack.c.bf16 (!%p2728_p2), %v2147_v53, %v2145_v51  ;;  %v2282_v32 = vld [vmem:[#allocation13 + $0x20] sm:$0xff] (!%p2728_p2)  ;;  %v2301_v35 = vld [vmem:[#allocation13 + $0xb8] sm:$0xff] (!%p2728_p2)  ;;  %v2163_v44 = vld [vmem:[#allocation10 + $0x110] sm:$0xff] (!%p2728_p2) }
 0x55d   : > { %v2088_v2 = vmax.f32 %v2084_v60, 0.0  ;;  %v2086_v5 = vadd.f32 %v2077_v49, %v2070_v19  ;;  %v2148_v49 = vld [vmem:[#allocation10 + $0x98] sm:$0xff] (!%p2728_p2)  ;;  %v2815_v60 = vpack.c.bf16 (!%p2728_p2), %v2152_v57, %v2150_v56  ;;  %v2149_v19 = vld [vmem:[#allocation10 + $0xa0] sm:$0xff] (!%p2728_p2)  ;;  %v2287_v57 = vld [vmem:[#allocation13 + $0x48] sm:$0xff] (!%p2728_p2) }
 0x55e   : > { %v2089_v6 = vmax.f32 %v2085_v62, 0.0  ;;  %v2087_v9 = vadd.f32 %v2081_v38, %v2071_v1  ;;  %2111 = sbr.rel (%p2728_p2) target bundleno = 2178 (0x882), region = 108  ;;  %2806 = vmatpush1.bf16.msra.mxu0 (!%p2728_p2), %v2805_v55  ;;  %v2811_v38 = vpack.c.bf16 (!%p2728_p2), %v2148_v49, %v2146_v48  ;;  %v2156_v62 = vld [vmem:[#allocation10 + $0xd8] sm:$0xff] (!%p2728_p2)  ;;  %v2817_v1 = vpack.c.bf16 (!%p2728_p2), %v2151_v28, %v2149_v19  ;;  %v2161_v43 = vld [vmem:[#allocation10 + $0x100] sm:$0xff] (!%p2728_p2) }
 0x55f   : > { %v4330_v10 = vadd.f32 %v2096_v61, %v2088_v2  ;;  %v2090_v11 = vmax.f32 %v2086_v5, 0.0  ;;  %2808 = vmatprep.subr.bf16.mxu0 (!%p2728_p2), %v2807_v39  ;;  %v2154_v61 = vld [vmem:[#allocation10 + $0xc8] sm:$0xff] (!%p2728_p2)  ;;  %v2153_v2 = vld [vmem:[#allocation10 + $0xc0] sm:$0xff] (!%p2728_p2)  ;;  %v2871_v55 = vpack.c.bf16 (!%p2728_p2), %v2301_v35, %v2300_v34  ;;  %v2829_v48 = vpack.c.bf16 (!%p2728_p2), %v2163_v44, %v2161_v43  ;;  %v2172_v51 = vld [vmem:[#allocation10 + $0x158] sm:$0xff] (!%p2728_p2) }
 0x560   : > { %v2101_v12 = vadd.f32 %v2097_v4, %v2089_v6  ;;  %v2091_v15 = vmax.f32 %v2087_v9, 0.0  ;;  %v2158_v4 = vld [vmem:[#allocation10 + $0xe8] sm:$0xff] (!%p2728_p2)  ;;  %v2819_v5 = vpack.c.bf16 (!%p2728_p2), %v2156_v62, %v2154_v61  ;;  %v2160_v6 = vld [vmem:[#allocation10 + $0xf8] sm:$0xff] (!%p2728_p2)  ;;  %v2821_v20 = vpack.c.bf16 (!%p2728_p2), %v2155_v3, %v2153_v2  ;;  %v2169_v61 = vld [vmem:[#allocation10 + $0x140] sm:$0xff] (!%p2728_p2) }
 0x561   : > { %2104 = vst [vmem:[#allocation2] sm:$0xff] %v4330_v10  ;;  %v4335_v16 = vadd.f32 %v2098_v8, %v2090_v11  ;;  %v2295_v8 = vld [vmem:[#allocation13 + $0x88] sm:$0xff] (!%p2728_p2)  ;;  %v2278_v11 = vld [vmem:[#allocation13] sm:$0xff] (!%p2728_p2)  ;;  %v2823_v24 = vpack.c.bf16 (!%p2728_p2), %v2160_v6, %v2158_v4  ;;  %v2285_v39 = vld [vmem:[#allocation13 + $0x38] sm:$0xff] (!%p2728_p2) }
 0x562   : > { %2105 = vst [vmem:[#allocation2 + $0x8] sm:$0xff] %v2101_v12  ;;  %v2103_v17 = vadd.f32 %v2099_v14, %v2091_v15  ;;  %2810 = vmatpush1.bf16.msra.mxu0 (!%p2728_p2), %v2809_v36  ;;  %v2859_v9 = vpack.c.bf16 (!%p2728_p2), %v2295_v8, %v2294_v7  ;;  %v2296_v14 = vld [vmem:[#allocation13 + $0x90] sm:$0xff] (!%p2728_p2)  ;;  %v2297_v15 = vld [vmem:[#allocation13 + $0x98] sm:$0xff] (!%p2728_p2)  ;;  %v2302_v40 = vld [vmem:[#allocation13 + $0xc0] sm:$0xff] (!%p2728_p2) }
 0x563   : > { %2106 = vst [vmem:[#allocation2 + $0x10] sm:$0xff] %v4335_v16  ;;  %2812 = vmatprep.subr.bf16.mxu0 (!%p2728_p2), %v2811_v38  ;;  %v2863_v21 = vpack.c.bf16 (!%p2728_p2), %v2297_v15, %v2296_v14  ;;  %v2167_v36 = vld [vmem:[#allocation10 + $0x130] sm:$0xff] (!%p2728_p2)  ;;  %v2875_v53 = vpack.c.bf16 (!%p2728_p2), %v2303_v47, %v2302_v40  ;;  %v2286_v56 = vld [vmem:[#allocation13 + $0x40] sm:$0xff] (!%p2728_p2)  ;;  %v2176_v3 = vld [vmem:[#allocation10 + $0x178] sm:$0xff] (!%p2728_p2) }
 0x564   : > { %2107 = vst [vmem:[#allocation2 + $0x18] sm:$0xff] %v2103_v17  ;;  %v2119_v22 = vadd.f32 (!%p2728_p2), %v2103_v17, %v2101_v12  ;;  %v2861_v12 = vpack.c.bf16 (!%p2728_p2), %v2279_v13, %v2278_v11  ;;  %v2280_v17 = vld [vmem:[#allocation13 + $0x10] sm:$0xff] (!%p2728_p2)  ;;  %2860 = vmatprep.subr.bf16.mxu1 (!%p2728_p2), %v2859_v9  ;;  %v2877_v2 = vpack.c.bf16 (!%p2728_p2), %v2287_v57, %v2286_v56  ;;  %v2289_v6 = vld [vmem:[#allocation13 + $0x58] sm:$0xff] (!%p2728_p2)  ;;  %v2306_v8 = vld [vmem:[#allocation13 + $0xe0] sm:$0xff] (!%p2728_p2) }
 0x565   : > { %v2865_v25 = vpack.c.bf16 %v2281_v18, %v2280_v17  ;;  %v2171_v62 = vld [vmem:[#allocation10 + $0x150] sm:$0xff]  ;;  %v2173_v11 = vld [vmem:[#allocation10 + $0x160] sm:$0xff]  ;;  %v2180_v15 = vld [vmem:[#allocation10 + $0x198] sm:$0xff] }
 0x566   : > { %v2120_v33 = vrot.slane %v2119_v22, 4  ;;  %2814 = vmatpush1.bf16.msra.mxu0 %v2813_v59  ;;  %2862 = vmatpush3.bf16.msra.mxu1 %v2861_v12  ;;  %v2304_v59 = vld [vmem:[#allocation13 + $0xd0] sm:$0xff]  ;;  %v2307_v9 = vld [vmem:[#allocation13 + $0xe8] sm:$0xff]  ;;  %v2181_v26 = vld [vmem:[#allocation10 + $0x1a0] sm:$0xff] }
 0x567   : > { %2816 = vmatprep.subr.bf16.mxu0 %v2815_v60  ;;  %2864 = vmatprep.subr.bf16.mxu1 %v2863_v21  ;;  %v2305_v60 = vld [vmem:[#allocation13 + $0xd8] sm:$0xff]  ;;  %v2175_v13 = vld [vmem:[#allocation10 + $0x170] sm:$0xff]  ;;  %v2178_v12 = vld [vmem:[#allocation10 + $0x188] sm:$0xff]  ;;  %v2883_v17 = vpack.c.bf16 %v2307_v9, %v2306_v8 }
 0x568   : > { %v2121_v41 = vadd.f32 %v2120_v33, %v2119_v22  ;;  %v2298_v22 = vld [vmem:[#allocation13 + $0xa0] sm:$0xff]  ;;  %v2283_v33 = vld [vmem:[#allocation13 + $0x28] sm:$0xff]  ;;  %v2879_v4 = vpack.c.bf16 %v2305_v60, %v2304_v59  ;;  %v2843_v21 = vpack.c.bf16 %v2180_v15, %v2178_v12  ;;  %v2293_v56 = vld [vmem:[#allocation13 + $0x78] sm:$0xff] }
 0x569   : > { %v2867_v31 = vpack.c.bf16 %v2299_v23, %v2298_v22  ;;  %v2869_v52 = vpack.c.bf16 %v2283_v33, %v2282_v32  ;;  %v2177_v22 = vld [vmem:[#allocation10 + $0x180] sm:$0xff]  ;;  %v2179_v23 = vld [vmem:[#allocation10 + $0x190] sm:$0xff]  ;;  %v2186_v32 = vld [vmem:[#allocation10 + $0x1c8] sm:$0xff] }
 0x56a   : > { %v2122_v54 = vrot.slane %v2121_v41, 2  ;;  %2818 = vmatpush1.bf16.msra.mxu0 %v2817_v1  ;;  %2866 = vmatpush3.bf16.msra.mxu1 %v2865_v25  ;;  %v2174_v1 = vld [vmem:[#allocation10 + $0x168] sm:$0xff]  ;;  %v2845_v30 = vpack.c.bf16 %v2179_v23, %v2177_v22  ;;  %v2188_v33 = vld [vmem:[#allocation10 + $0x1d8] sm:$0xff]  ;;  %v2187_v43 = vld [vmem:[#allocation10 + $0x1d0] sm:$0xff] }
 0x56b   : > { %2820 = vmatprep.subr.bf16.mxu0 %v2819_v5  ;;  %2868 = vmatprep.subr.bf16.mxu1 %v2867_v31  ;;  %v2288_v5 = vld [vmem:[#allocation13 + $0x50] sm:$0xff]  ;;  %v2190_v44 = vld [vmem:[#allocation10 + $0x1e8] sm:$0xff]  ;;  %v2396_v15 = vld [vmem:[#allocation16] sm:$0x1] }
 0x56c   : > { %v2123_v37 = vadd.f32 %v2122_v54, %v2121_v41  ;;  %v2825_v41 = vpack.c.bf16 %v2159_v29, %v2157_v27  ;;  %v2168_v54 = vld [vmem:[#allocation10 + $0x138] sm:$0xff]  ;;  %v2881_v14 = vpack.c.bf16 %v2289_v6, %v2288_v5  ;;  %v2183_v31 = vld [vmem:[#allocation10 + $0x1b0] sm:$0xff]  ;;  %v2310_v5 = vld [vmem:[#allocation14] sm:$0x1] }
 0x56d   : > { %v2831_v49 = vpack.c.bf16 %v2168_v54, %v2166_v46  ;;  %v2184_v27 = vld [vmem:[#allocation10 + $0x1b8] sm:$0xff]  ;;  %v2849_v35 = vpack.c.bf16 %v2183_v31, %v2181_v26 }
 0x56e   : > { %v2124_v50 = vrot.slane %v2123_v37, 1  ;;  %2822 = vmatpush1.bf16.msra.mxu0 %v2821_v20  ;;  %2870 = vmatpush3.bf16.msra.mxu1 %v2869_v52  ;;  %v2841_v20 = vpack.c.bf16 %v2175_v13, %v2173_v11  ;;  %v2192_v46 = vld [vmem:[#allocation10 + $0x1f8] sm:$0xff] }
 0x56f   : > { %2824 = vmatprep.subr.bf16.mxu0 %v2823_v24  ;;  %2872 = vmatprep.subr.bf16.mxu1 %v2871_v55  ;;  %v2182_v24 = vld [vmem:[#allocation10 + $0x1a8] sm:$0xff]  ;;  %v2855_v55 = vpack.c.bf16 %v2192_v46, %v2190_v44 }
 0x570   : > { %v2125_v45 = vadd.f32 %v2124_v50, %v2123_v37  ;;  %v2284_v37 = vld [vmem:[#allocation13 + $0x30] sm:$0xff]  ;;  %v2165_v50 = vld [vmem:[#allocation10 + $0x120] sm:$0xff]  ;;  %v2847_v25 = vpack.c.bf16 %v2184_v27, %v2182_v24 }
 0x571   : > { %v2873_v38 = vpack.c.bf16 %v2285_v39, %v2284_v37  ;;  %v2833_v19 = vpack.c.bf16 %v2167_v36, %v2165_v50  ;;  %v2189_v37 = vld [vmem:[#allocation10 + $0x1e0] sm:$0xff]  ;;  %v2191_v39 = vld [vmem:[#allocation10 + $0x1f0] sm:$0xff] }
 0x572   : > { %v2128_v58 = vmul.f32 0.0625, %v2125_v45  ;;  %2826 = vmatpush1.bf16.msra.mxu0 %v2825_v41  ;;  %v2170_v45 = vld [vmem:[#allocation10 + $0x148] sm:$0xff]  ;;  %v2851_v41 = vpack.c.bf16 %v2188_v33, %v2186_v32  ;;  %v2857_v47 = vpack.c.bf16 %v2191_v39, %v2189_v37 }
 0x573   : > { %2828 = vmatprep.subr.bf16.mxu0 %v2827_v42  ;;  %v2835_v28 = vpack.c.bf16 %v2172_v51, %v2170_v45  ;;  %2874 = vmatpush3.bf16.msra.mxu1 %v2873_v38  ;;  %v2185_v42 = vld [vmem:[#allocation10 + $0x1c0] sm:$0xff]  ;;  %v2291_v50 = vld [vmem:[#allocation13 + $0x68] sm:$0xff]  ;;  %v2308_v45 = vld [vmem:[#allocation13 + $0xf0] sm:$0xff] }
 0x574   : > { %2269 = vmatprep.mubr.f32.mxu0 %v2128_v58  ;;  %v2112_v58 = vadd.f32 %v4335_v16, %v4330_v10  ;;  %2876 = vmatprep.subr.bf16.mxu1 %v2875_v53  ;;  %v2837_v10 = vpack.c.bf16 %v2171_v62, %v2169_v61  ;;  %v2839_v16 = vpack.c.bf16 %v2176_v3, %v2174_v1  ;;  %v2309_v38 = vld [vmem:[#allocation13 + $0xf8] sm:$0xff]  ;;  %v2292_v53 = vld [vmem:[#allocation13 + $0x70] sm:$0xff] }
 0x575   : > { %v2853_v54 = vpack.c.bf16 %v2187_v43, %v2185_v42  ;;  %v2887_v51 = vpack.c.bf16 %v2309_v38, %v2308_v45  ;;  %v2889_v57 = vpack.c.bf16 %v2293_v56, %v2292_v53 }
 0x576   : > { %2830 = vmatpush1.bf16.msra.mxu0 %v2829_v48  ;;  %v2113_v7 = vrot.slane %v2112_v58, 4 }
 0x577   : > { %2832 = vmatprep.subr.bf16.mxu0 %v2831_v49  ;;  %2878 = vmatpush3.bf16.msra.mxu1 %v2877_v2  ;;  %v2290_v49 = vld [vmem:[#allocation13 + $0x60] sm:$0xff] }
 0x578   : > { %2880 = vmatprep.subr.bf16.mxu1 %v2879_v4  ;;  %v2114_v18 = vadd.f32 %v2113_v7, %v2112_v58  ;;  %v2885_v36 = vpack.c.bf16 %v2291_v50, %v2290_v49  ;;  %v2193_v58 = vld [vmem:[#allocation11] sm:$0x3] }
 0x579   : > { %v2198_v59 = vrot.slane %v2193_v58, %v4268_v63  ;;  %v2202_v60 = vrot.slane %v2193_v58, %v4270_v0 }
 0x57a   : > { %2834 = vmatpush1.bf16.msra.mxu0 %v2833_v19  ;;  %v2115_v29 = vrot.slane %v2114_v18, 2 }
 0x57b   : > { %2836 = vmatprep.subr.bf16.mxu0 %v2835_v28  ;;  %2882 = vmatpush3.bf16.msra.mxu1 %v2881_v14 }
 0x57c   : > { %2884 = vmatprep.subr.bf16.mxu1 %v2883_v17  ;;  %v2116_v34 = vadd.f32 %v2115_v29, %v2114_v18  ;;  %v2398_v18 = vld [vmem:[#allocation17] sm:$0x1] }
 0x57e   : > { %2838 = vmatpush1.bf16.msra.mxu0 %v2837_v10  ;;  %v2117_v52 = vrot.slane %v2116_v34, 1 }
 0x57f   : > { %2840 = vmatprep.subr.bf16.mxu0 %v2839_v16  ;;  %2886 = vmatpush3.bf16.msra.mxu1 %v2885_v36 }
 0x580   : > { %v2118_v40 = vadd.f32 %v2117_v52, %v2116_v34  ;;  %2888 = vmatprep.subr.bf16.mxu1 %v2887_v51 }
 0x582   : > { %2842 = vmatpush1.bf16.msra.mxu0 %v2841_v20  ;;  %v2127_v48 = vmul.f32 0.0625, %v2118_v40 }
 0x583   : > { %2844 = vmatprep.subr.bf16.mxu0 %v2843_v21  ;;  %2890 = vmatpush3.bf16.msra.mxu1 %v2889_v57 }
 0x586   : > { %2846 = vmatpush1.bf16.msra.mxu0 %v2845_v30 }
 0x587   : > { %2848 = vmatprep.subr.bf16.mxu0 %v2847_v25 }
 0x58a   : > { %2850 = vmatpush1.bf16.msra.mxu0 %v2849_v35 }
 0x58b   : > { %2852 = vmatprep.subr.bf16.mxu0 %v2851_v41 }
 0x58e   : > { %2854 = vmatpush1.bf16.msra.mxu0 %v2853_v54 }
 0x58f   : > { %2856 = vmatprep.subr.bf16.mxu0 %v2855_v55 }
 0x592   : > { %2858 = vmatpush1.bf16.msra.mxu0 %v2857_v47 }
 0x595   : > { %2270 = vmatmul.mubr.f32.vlgmr.msra.gmra.mrb[0].mxu0 %v2127_v48 }
 0x668   : > { %v2271_v19 = vpop.f32.mrb[0].mxu0 }
 0x669   : > { %v2272_v28 = vadd.f32 %v2271_v19, %v2198_v59  ;;  %v2273_v61 = vpop.f32.mrb[1].mxu0 }
 0x66a   : > { %v2274_v62 = vadd.f32 %v2273_v61, %v2202_v60 }
 0x66b   : > { %v2276_v2 = vmax.f32 %v2272_v28, 0.0 }
 0x66c   : > { %v2277_v1 = vmax.f32 %v2274_v62, 0.0 }
 0x66e   : > { %2375 = vmatprep.mubr.f32.mxu1 %v2277_v1 }
 0x66f   : > { %2376 = vmatmul.mubr.f32.vlgmr.msra.gmra.mrb[0].mxu1 %v2276_v2 }
 0x742   : > { %v2792_v3 = vpop.f32.mrb[0].mxu1 }
 0x743   : > { %v2793_v4 = vpop.f32.mrb[1].mxu1 }
 0x744   : > { %v2794_v6 = vadd.f32 %v2793_v4, %v2792_v3 }
 0x746   : > { %v2378_v7 = vadd.f32 %v2794_v6, %v2310_v5 }
 0x748   : > { %v2382_v8 = vsel %vm2381_vm2, %v2378_v7, 0.0 }
 0x749   : > { %2383 = vadd.xlane.f32.xlu0 %v2382_v8 }
 0x7d6   : > { %v2384_v63 = vpop.xlane.xlu0 %2383 }
 0x7d7   : > { %v2386_v9 = vmul.f32 0.03125, %v2384_v63 }
 0x7d9   : > { %v2387_v0 = vsub.f32 %v2378_v7, %v2386_v9 }
 0x7db   : > { %v2388_v10 = vmul.f32 %v2387_v0, %v2387_v0 }
 0x7dd   : > { %v2389_v16 = vsel %vm2381_vm2, %v2388_v10, 0.0 }
 0x7de   : > { %2390 = vadd.xlane.f32.xlu0 %v2389_v16 }
 0x86b   : > { %v2391_v11 = vpop.xlane.xlu0 %2390 }
 0x86c   : > { %v2392_v13 = vmul.f32 0.03125, %v2391_v11 }
 0x86e   : > { %v2393_v14 = vadd.f32 1e-05, %v2392_v13 }
 0x870   : > { %3291 = vrsqrt.f32 %v2393_v14 }
 0x87a   : > { %v3292_v12 = vpop.eup %3291 }
 0x87b   : > { %v2395_v17 = vmul.f32 %v3292_v12, %v2387_v0 }
 0x87d   : > { %v2397_v20 = vmul.f32 %v2396_v15, %v2395_v17 }
 0x87f   : > { %v2399_v21 = vadd.f32 %v2398_v18, %v2397_v20 }
 0x881   : > { %2400 = vst.msk [vmem:[#allocation19] sm:$0x1] %vm2381_vm2, %v2399_v21 }
 0x882 PF: > { %p2983_p9 = scmp.eq.s32.totalorder %s3767_s19, 2  ;;  %s3690_s5 = smov [#allocation19]  }
 0x883   : > { %s2408_s28 = sshll.u32 %s3690_s5, 4  ;;  %s2409_s28 = int_to_ptr.vmem [resolvable:$true] %s2408_s28 }
 0x884   : > { %s3577_s23 = scalar_lea.vmem %s2409_s28, 16  ;;  %s3583_s26 = scalar_lea.vmem %s2409_s28, 32 }
 0x885   : > { %p3578_p10 = scmp.ne.s32.totalorder %s2409_s28, %s3577_s23  ;;  %p3584_p4 = scmp.lt.s32.totalorder %s2409_s28, %s2409_s28 }
 0x886   : > { %p3585_p12 = scmp.lt.s32.totalorder %s3583_s26, %s3577_s23 }
 0x887   : > { %p3579_p7 = pnand %p3578_p10, %p2983_p9 }
 0x888   : > { %p3586_p8 = por %p3585_p12, %p3584_p4 }
 0x889   : > { %p3580_p1 = pneg %p3579_p7 }
 0x88b   : > { %p3587_p5 = pnand %p3586_p8, %p3580_p1 }
 0x88d   : > { %3590 = shalt.err (!%p3587_p5)
}
 0x88e   : > { %s4451_s18 = sld [smem:[#allocation35_spill]] }
 0x894   : > { %s3591_s13 = scalar_lea.hbm %s4451_s18, 16 }
 0x895   : > { %p3592_p3 = scmp.ne.s32.totalorder %s4451_s18, %s3591_s13  ;;  %p3597_p11 = scmp.lt.u32.totalorder %s3591_s13, %s4451_s18 }
 0x897   : > { %p3593_p6 = pnand %p3592_p3, %p2983_p9 }
 0x899   : > { %p3594_p13 = pneg %p3593_p6 }
 0x89b   : > { %p3599_p0 = pnand %p3597_p11, %p3594_p13 }
 0x89d   : > { %3602 = shalt.err (!%p3599_p0)
}
 0x89e   : > { %2931 = dma.vmem_to_hbm [thread:$0]  (%p2983_p9), %s2409_s28, 16, %s4451_s18, [#allocation5]  }
 0x89f   : > { %3648 = dma.done.wait (%p2983_p9), [#allocation5], 16  }
 0x8a0   : > { %3650 = vsyncadd (%p2983_p9), [#allocation5], 4294967280 }
 0x8a1 PF: > { %p23_p2 = scmp.ge.s32.totalorder %s3884_s24, 5   ;;  %s4452_s13 = smov %s3657_s14 }
 0x8a2   : > { %s4453_s14 = smov %s3661_s15  ;;  %s4454_s15 = smov %s3896_s30 }
 0x8a3   : > { %s4455_s16 = smov %s3884_s24  ;;  %25 = sbr.rel (!%p23_p2) target bundleno = 15 (0xf), region = 147 }
 0x8aa   :  { %2421 = vsyncpa [#allocation4], 1 }
 0x8ab   :  { %2423 = vsyncpa [#allocation4 + $0x1], 1 }
 0x8ac   :  { %2424 = vsyncpa [#allocation7], 1 }
 0x8ad   :  { %2425 = vsyncpa [#allocation12], 1 }
 0x8ae   :  { %2426 = vsyncpa [#allocation15], 1 }
 0x8af   :  { %2427 = vsyncpa [#allocation18], 1 }
 0x8b0   :  { %2428 = vsyncpa [#allocation5], 1 }
 0x8b1   :  { %2430 = vsyncpa [#allocation5 + $0x1], 1 }

</bundles_post_ra>
